<compile_context>
chip_gen: v7x
topology: tpu7x:2x2x1
jax: 0.10.0
libtpu: 0.0.40
codegen_flags: <defaults>
</compile_context>

<pallas_src>
import functools

import jax
import jax.numpy as jnp
import numpy as np
from jax.experimental import pallas as pl
from jax.experimental.pallas import tpu as pltpu

NEG_SLOPE = 0.01
BN_EPS = 1e-5


# ------------------------------ Pallas kernel ------------------------------- #

def _dense_block_kernel(x_ref, w1_ref, w2a_ref, w2b_ref, gb_ref, mask_ref,
                        res_ref, pool_ref, *, offsets, inv_n, wp, pp):
    """Fused DenseDownBlock_first forward on the flat padded grid.

    x_ref   : (Cp, Pp)   zero-padded input, channels-first, flat (N, H+2, W+2) spatial;
                         channel rows >= Cin and flat positions >= P are zero.
    w1_ref  : (Cp, 9*Cp) conv1 weights, tap-major columns (padded rows/cols are zero).
    w2a_ref : (Cout, 9*Cp) conv2 weights for the out_1 half of the channel concat.
    w2b_ref : (Cout, 9*Cp) conv2 weights for the x half of the channel concat.
    gb_ref  : (Cp, 2)    BatchNorm gamma / beta (shared `self.norm`), padded with (1, 0).
    mask_ref: (1, Pp)    1.0 on valid interior pixels, 0.0 on the padding ring / tail.
    res_ref : (Cout, Pp) residual_out on the padded grid.
    pool_ref: (Cout, Pp) 2x2 max-pool value stored at each window's top-left position.
    """
    x = x_ref[...]
    mask = mask_ref[...]
    gamma = gb_ref[:, 0:1]
    beta = gb_ref[:, 1:2]
    cout = res_ref.shape[0]

    def shift(a, off):
        # shifted[:, p] == a[:, p + off]; wrap-around only ever lands on masked positions.
        s = (-off) % pp
        return a if s == 0 else pltpu.roll(a, s, 1)

    def taps_of(a):
        # (Cp, Pp) -> (9*Cp, Pp): tile-aligned sublane concat of the nine 3x3 tap shifts,
        # so each conv is a single K = 9*Cp MXU matmul.
        return jnp.concatenate([shift(a, o) for o in offsets], axis=0)

    def bn_lrelu(z, g, b):
        # BatchNorm2d(track_running_stats=False): batch statistics over valid pixels only.
        mean = jnp.sum(z * mask, axis=1, keepdims=True) * inv_n
        d = (z - mean) * mask
        var = jnp.sum(d * d, axis=1, keepdims=True) * inv_n          # biased, like PyTorch BN
        y = d * jax.lax.rsqrt(var + BN_EPS) * g + b
        y = jnp.where(y >= 0.0, y, NEG_SLOPE * y)                    # LeakyReLU(0.01)
        return y * mask    # zero the border: this IS the zero padding the next conv sees

    x_taps = taps_of(x)                                              # reused by both convs
    z1 = jnp.dot(w1_ref[...], x_taps, preferred_element_type=jnp.float32)
    out1 = bn_lrelu(z1, gamma, beta)                                 # (Cp, Pp), stays in VMEM

    # conv2 over concat([out_1, x]) without materializing the concat: split weight slabs.
    z2 = (jnp.dot(w2a_ref[...], taps_of(out1), preferred_element_type=jnp.float32)
          + jnp.dot(w2b_ref[...], x_taps, preferred_element_type=jnp.float32))
    residual = bn_lrelu(z2, gamma[:cout], beta[:cout])               # (Cout, Pp)
    res_ref[...] = residual

    # fused MaxPool2d(2, stride=2): all four window taps are valid interior positions.
    pool_ref[...] = jnp.maximum(
        jnp.maximum(residual, shift(residual, 1)),
        jnp.maximum(shift(residual, wp), shift(residual, wp + 1)))


# --------------------------------- wrapper ----------------------------------- #

def dense_down_layer_first(x_nchw, params):
    """Forward of DenseDownLayer_first (== one DenseDownBlock_first), eval mode.

    Takes / returns NCHW like the PyTorch module.  Returns (pooled, residual_out).
    """
    x_nchw = x_nchw.astype(jnp.float32)
    N, C, H, W = x_nchw.shape
    assert H % 2 == 0 and W % 2 == 0, "MaxPool2d(2, 2) expects even spatial dims"
    Hp, Wp = H + 2, W + 2
    P = N * Hp * Wp                       # flat padded-grid length
    Pp = ((P + 127) // 128) * 128         # lane-aligned
    Cp = ((C + 7) // 8) * 8               # sublane-aligned channel count
    inv_n = 1.0 / float(N * H * W)

    # --- glue: layout prep (tiny compared with the conv work; done once per call) --- #
    xpad = jnp.pad(x_nchw, ((0, 0), (0, 0), (1, 1), (1, 1)))          # (N, C, Hp, Wp)
    xflat = jnp.transpose(xpad, (1, 0, 2, 3)).reshape(C, P)           # channels-first, flat
    xflat = jnp.pad(xflat, ((0, Cp - C), (0, Pp - P)))                # (Cp, Pp)

    m = np.zeros((N, Hp, Wp), np.float32)
    m[:, 1:H + 1, 1:W + 1] = 1.0
    mask = np.zeros((1, Pp), np.float32)
    mask[0, :P] = m.reshape(-1)
    mask = jnp.asarray(mask)

    # conv1 weight: OIHW -> (Cp, 9*Cp), tap-major columns, zero-padded channels.
    w1t = jnp.transpose(params["w1"], (0, 2, 3, 1))                   # (C, 3, 3, C)
    w1m = jnp.pad(w1t, ((0, Cp - C), (0, 0), (0, 0), (0, Cp - C))).reshape(Cp, 9 * Cp)
    # conv2 weight split into the out_1 half and the x half of the channel concat.
    w2a = jnp.transpose(params["w2"][:, :C], (0, 2, 3, 1))            # (C, 3, 3, C)
    w2b = jnp.transpose(params["w2"][:, C:], (0, 2, 3, 1))            # (C, 3, 3, C)
    w2am = jnp.pad(w2a, ((0, 0), (0, 0), (0, 0), (0, Cp - C))).reshape(C, 9 * Cp)
    w2bm = jnp.pad(w2b, ((0, 0), (0, 0), (0, 0), (0, Cp - C))).reshape(C, 9 * Cp)
    # note: conv biases b1/b2 are dropped — cancelled exactly by the batch-stat BN mean.

    gamma_p = jnp.concatenate([params["gamma"].astype(jnp.float32),
                               jnp.ones((Cp - C,), jnp.float32)])
    beta_p = jnp.concatenate([params["beta"].astype(jnp.float32),
                              jnp.zeros((Cp - C,), jnp.float32)])
    gb = jnp.stack([gamma_p, beta_p], axis=1)                         # (Cp, 2)

    offsets = tuple((ky - 1) * Wp + (kx - 1) for ky in range(3) for kx in range(3))
    kernel = functools.partial(_dense_block_kernel, offsets=offsets,
                               inv_n=inv_n, wp=Wp, pp=Pp)

    residual_flat, pooled_flat = pl.pallas_call(
        kernel,
        out_shape=(jax.ShapeDtypeStruct((C, Pp), jnp.float32),
                   jax.ShapeDtypeStruct((C, Pp), jnp.float32)),
        grid=(1,),
        in_specs=[
            pl.BlockSpec((Cp, Pp), lambda i: (0, 0)),
            pl.BlockSpec((Cp, 9 * Cp), lambda i: (0, 0)),
            pl.BlockSpec((C, 9 * Cp), lambda i: (0, 0)),
            pl.BlockSpec((C, 9 * Cp), lambda i: (0, 0)),
            pl.BlockSpec((Cp, 2), lambda i: (0, 0)),
            pl.BlockSpec((1, Pp), lambda i: (0, 0)),
        ],
        out_specs=(pl.BlockSpec((C, Pp), lambda i: (0, 0)),
                   pl.BlockSpec((C, Pp), lambda i: (0, 0))),
    )(xflat, w1m, w2am, w2bm, gb, mask)

    # --- glue: extract the valid interior and return NCHW like PyTorch --- #
    res_grid = residual_flat[:, :P].reshape(C, N, Hp, Wp)
    pool_grid = pooled_flat[:, :P].reshape(C, N, Hp, Wp)
    residual_out = jnp.transpose(res_grid[:, :, 1:H + 1, 1:W + 1], (1, 0, 2, 3))
    out = jnp.transpose(pool_grid[:, :, 1:H + 1:2, 1:W + 1:2], (1, 0, 2, 3))
    return out, residual_out


# --------------------------- pure-JAX reference ----------------------------- #

def _ref_conv(x_nchw, w, b):
    y = jax.lax.conv_general_dilated(
        x_nchw, w, window_strides=(1, 1), padding=((1, 1), (1, 1)),
        dimension_numbers=("NCHW", "OIHW", "NCHW"))
    return y + b[None, :, None, None]


def _ref_bn_lrelu(y, gamma, beta):
    mean = y.mean(axis=(0, 2, 3), keepdims=True)
    var = y.var(axis=(0, 2, 3), keepdims=True)  # biased, like BN normalization
    z = (y - mean) / jnp.sqrt(var + BN_EPS)
    z = z * gamma[None, :, None, None] + beta[None, :, None, None]
    return jnp.where(z >= 0.0, z, NEG_SLOPE * z)


def ref_forward(x, p):
    out_1 = _ref_bn_lrelu(_ref_conv(x, p["w1"], p["b1"]), p["gamma"], p["beta"])
    cat = jnp.concatenate([out_1, x], axis=1)
    residual_out = _ref_bn_lrelu(_ref_conv(cat, p["w2"], p["b2"]),
                                 p["gamma"], p["beta"])
    pooled = jax.lax.reduce_window(residual_out, -jnp.inf, jax.lax.max,
                                   (1, 1, 2, 2), (1, 1, 2, 2), "VALID")
    return pooled, residual_out


# --------------------------------- main -------------------------------------- #

if __name__ == "__main__":
    key = jax.random.PRNGKey(0)
    kx, k1, k2, k3, k4, k5, k6 = jax.random.split(key, 7)
    N, C, H, W = 2, 4, 16, 16      # in_channel=4, kernel_size=3 (padding=1 => "same")

    x = jax.random.normal(kx, (N, C, H, W), jnp.float32)
    params = dict(
        w1=0.1 * jax.random.normal(k1, (C, C, 3, 3), jnp.float32),
        b1=0.1 * jax.random.normal(k2, (C,), jnp.float32),
        w2=0.1 * jax.random.normal(k3, (C, 2 * C, 3, 3), jnp.float32),
        b2=0.1 * jax.random.normal(k4, (C,), jnp.float32),
        gamma=1.0 + 0.1 * jax.random.normal(k5, (C,), jnp.float32),
        beta=0.1 * jax.random.normal(k6, (C,), jnp.float32),
    )

    fwd = jax.jit(dense_down_layer_first)
    out, residual_out = jax.block_until_ready(fwd(x, params))
    assert out.shape == (N, C, H // 2, W // 2)
    assert residual_out.shape == (N, C, H, W)

    ref_out, ref_res = ref_forward(x, params)
    np.testing.assert_allclose(np.asarray(out), np.asarray(ref_out),
                               rtol=1e-4, atol=1e-4)
    np.testing.assert_allclose(np.asarray(residual_out), np.asarray(ref_res),
                               rtol=1e-4, atol=1e-4)
    print("KERNEL_OK")
</pallas_src>

<mosaic_0001>
module attributes {stable_mosaic.version = 11 : i64} {
  func.func @_dense_block_kernel(%arg0: i32, %arg1: memref<8x768xf32, #tpu.memory_space<vmem>>, %arg2: memref<8x72xf32, #tpu.memory_space<vmem>>, %arg3: memref<4x72xf32, #tpu.memory_space<vmem>>, %arg4: memref<4x72xf32, #tpu.memory_space<vmem>>, %arg5: memref<8x2xf32, #tpu.memory_space<vmem>>, %arg6: memref<1x768xf32, #tpu.memory_space<vmem>>, %arg7: memref<4x768xf32, #tpu.memory_space<vmem>>, %arg8: memref<4x768xf32, #tpu.memory_space<vmem>>) attributes {dimension_semantics = [#tpu.dimension_semantics<arbitrary>], iteration_bounds = array<i64: 1>, scalar_prefetch = 0 : i64, scratch_operands = 0 : i64, tpu.core_type = #tpu.core_type<tc>, window_params = [{pipeline_mode = #tpu.pipeline_mode<synchronous>, transform_indices = @transform_0, window_bounds = array<i64: 8, 768>}, {pipeline_mode = #tpu.pipeline_mode<synchronous>, transform_indices = @transform_1, window_bounds = array<i64: 8, 72>}, {pipeline_mode = #tpu.pipeline_mode<synchronous>, transform_indices = @transform_2, window_bounds = array<i64: 4, 72>}, {pipeline_mode = #tpu.pipeline_mode<synchronous>, transform_indices = @transform_3, window_bounds = array<i64: 4, 72>}, {pipeline_mode = #tpu.pipeline_mode<synchronous>, transform_indices = @transform_4, window_bounds = array<i64: 8, 2>}, {pipeline_mode = #tpu.pipeline_mode<synchronous>, transform_indices = @transform_5, window_bounds = array<i64: 1, 768>}, {pipeline_mode = #tpu.pipeline_mode<synchronous>, transform_indices = @transform_6, window_bounds = array<i64: 4, 768>}, {pipeline_mode = #tpu.pipeline_mode<synchronous>, transform_indices = @transform_7, window_bounds = array<i64: 4, 768>}]} {
    %c0 = arith.constant 0 : index
    %c0_0 = arith.constant 0 : index
    %0 = vector.load %arg1[%c0, %c0_0] : memref<8x768xf32, #tpu.memory_space<vmem>>, vector<8x768xf32>
    %c0_1 = arith.constant 0 : index
    %c0_2 = arith.constant 0 : index
    %1 = vector.load %arg6[%c0_1, %c0_2] : memref<1x768xf32, #tpu.memory_space<vmem>>, vector<1x768xf32>
    %c0_3 = arith.constant 0 : index
    %c0_4 = arith.constant 0 : index
    %2 = vector.load %arg5[%c0_3, %c0_4] : memref<8x2xf32, #tpu.memory_space<vmem>>, vector<8x1xf32>
    %c0_5 = arith.constant 0 : index
    %c1 = arith.constant 1 : index
    %3 = vector.load %arg5[%c0_5, %c1] : memref<8x2xf32, #tpu.memory_space<vmem>>, vector<8x1xf32>
    %c19_i32 = arith.constant 19 : i32
    %4 = tpu.dynamic_rotate %0 by %c19_i32 dim 1 : vector<8x768xf32>, i32 -> vector<8x768xf32>
    %c18_i32 = arith.constant 18 : i32
    %5 = tpu.dynamic_rotate %0 by %c18_i32 dim 1 : vector<8x768xf32>, i32 -> vector<8x768xf32>
    %c17_i32 = arith.constant 17 : i32
    %6 = tpu.dynamic_rotate %0 by %c17_i32 dim 1 : vector<8x768xf32>, i32 -> vector<8x768xf32>
    %c1_i32 = arith.constant 1 : i32
    %7 = tpu.dynamic_rotate %0 by %c1_i32 dim 1 : vector<8x768xf32>, i32 -> vector<8x768xf32>
    %c767_i32 = arith.constant 767 : i32
    %8 = tpu.dynamic_rotate %0 by %c767_i32 dim 1 : vector<8x768xf32>, i32 -> vector<8x768xf32>
    %c751_i32 = arith.constant 751 : i32
    %9 = tpu.dynamic_rotate %0 by %c751_i32 dim 1 : vector<8x768xf32>, i32 -> vector<8x768xf32>
    %c750_i32 = arith.constant 750 : i32
    %10 = tpu.dynamic_rotate %0 by %c750_i32 dim 1 : vector<8x768xf32>, i32 -> vector<8x768xf32>
    %c749_i32 = arith.constant 749 : i32
    %11 = tpu.dynamic_rotate %0 by %c749_i32 dim 1 : vector<8x768xf32>, i32 -> vector<8x768xf32>
    %12 = tpu.concatenate %4, %5, %6, %7, %0, %8, %9, %10, %11 in 0 : vector<8x768xf32>, vector<8x768xf32>, vector<8x768xf32>, vector<8x768xf32>, vector<8x768xf32>, vector<8x768xf32>, vector<8x768xf32>, vector<8x768xf32>, vector<8x768xf32> -> vector<72x768xf32>
    %c0_6 = arith.constant 0 : index
    %c0_7 = arith.constant 0 : index
    %13 = vector.load %arg2[%c0_6, %c0_7] : memref<8x72xf32, #tpu.memory_space<vmem>>, vector<8x72xf32>
    %cst = arith.constant dense<0.000000e+00> : vector<8x768xf32>
    %14 = tpu.matmul %13, %12, %cst {dimension_numbers = #tpu.dot_dimension_numbers<[1], [0], [0], [1], [0, 0, 1, 1], [], []>} : vector<8x72xf32>, vector<72x768xf32>, vector<8x768xf32> -> vector<8x768xf32>
    %15 = vector.broadcast %1 : vector<1x768xf32> to vector<8x768xf32>
    %16 = arith.mulf %14, %15 : vector<8x768xf32>
    %cst_8 = arith.constant dense<0.000000e+00> : vector<8xf32>
    %17 = vector.multi_reduction <add>, %16, %cst_8 [1] : vector<8x768xf32> to vector<8xf32>
    %18 = vector.shape_cast %17 : vector<8xf32> to vector<8x1xf32>
    %cst_9 = arith.constant 0.001953125 : f32
    %19 = vector.broadcast %cst_9 : f32 to vector<8x1xf32>
    %20 = arith.mulf %18, %19 : vector<8x1xf32>
    %21 = vector.broadcast %20 : vector<8x1xf32> to vector<8x768xf32>
    %22 = arith.subf %14, %21 : vector<8x768xf32>
    %23 = vector.broadcast %1 : vector<1x768xf32> to vector<8x768xf32>
    %24 = arith.mulf %22, %23 : vector<8x768xf32>
    %25 = arith.mulf %24, %24 : vector<8x768xf32>
    %cst_10 = arith.constant dense<0.000000e+00> : vector<8xf32>
    %26 = vector.multi_reduction <add>, %25, %cst_10 [1] : vector<8x768xf32> to vector<8xf32>
    %27 = vector.shape_cast %26 : vector<8xf32> to vector<8x1xf32>
    %cst_11 = arith.constant 0.001953125 : f32
    %28 = vector.broadcast %cst_11 : f32 to vector<8x1xf32>
    %29 = arith.mulf %27, %28 : vector<8x1xf32>
    %cst_12 = arith.constant 9.99999974E-6 : f32
    %30 = vector.broadcast %cst_12 : f32 to vector<8x1xf32>
    %31 = arith.addf %29, %30 : vector<8x1xf32>
    %32 = math.rsqrt %31 : vector<8x1xf32>
    %33 = vector.broadcast %32 : vector<8x1xf32> to vector<8x768xf32>
    %34 = arith.mulf %24, %33 : vector<8x768xf32>
    %35 = vector.broadcast %2 : vector<8x1xf32> to vector<8x768xf32>
    %36 = arith.mulf %34, %35 : vector<8x768xf32>
    %37 = vector.broadcast %3 : vector<8x1xf32> to vector<8x768xf32>
    %38 = arith.addf %36, %37 : vector<8x768xf32>
    %cst_13 = arith.constant 0.000000e+00 : f32
    %39 = vector.broadcast %cst_13 : f32 to vector<8x768xf32>
    %40 = arith.cmpf oge, %38, %39 : vector<8x768xf32>
    %cst_14 = arith.constant 0.00999999977 : f32
    %41 = vector.broadcast %cst_14 : f32 to vector<8x768xf32>
    %42 = arith.mulf %41, %38 : vector<8x768xf32>
    %43 = arith.select %40, %38, %42 : vector<8x768xi1>, vector<8x768xf32>
    %44 = vector.broadcast %1 : vector<1x768xf32> to vector<8x768xf32>
    %45 = arith.mulf %43, %44 : vector<8x768xf32>
    %c0_15 = arith.constant 0 : index
    %c0_16 = arith.constant 0 : index
    %46 = vector.load %arg3[%c0_15, %c0_16] : memref<4x72xf32, #tpu.memory_space<vmem>>, vector<4x72xf32>
    %c19_i32_17 = arith.constant 19 : i32
    %47 = tpu.dynamic_rotate %45 by %c19_i32_17 dim 1 : vector<8x768xf32>, i32 -> vector<8x768xf32>
    %c18_i32_18 = arith.constant 18 : i32
    %48 = tpu.dynamic_rotate %45 by %c18_i32_18 dim 1 : vector<8x768xf32>, i32 -> vector<8x768xf32>
    %c17_i32_19 = arith.constant 17 : i32
    %49 = tpu.dynamic_rotate %45 by %c17_i32_19 dim 1 : vector<8x768xf32>, i32 -> vector<8x768xf32>
    %c1_i32_20 = arith.constant 1 : i32
    %50 = tpu.dynamic_rotate %45 by %c1_i32_20 dim 1 : vector<8x768xf32>, i32 -> vector<8x768xf32>
    %c767_i32_21 = arith.constant 767 : i32
    %51 = tpu.dynamic_rotate %45 by %c767_i32_21 dim 1 : vector<8x768xf32>, i32 -> vector<8x768xf32>
    %c751_i32_22 = arith.constant 751 : i32
    %52 = tpu.dynamic_rotate %45 by %c751_i32_22 dim 1 : vector<8x768xf32>, i32 -> vector<8x768xf32>
    %c750_i32_23 = arith.constant 750 : i32
    %53 = tpu.dynamic_rotate %45 by %c750_i32_23 dim 1 : vector<8x768xf32>, i32 -> vector<8x768xf32>
    %c749_i32_24 = arith.constant 749 : i32
    %54 = tpu.dynamic_rotate %45 by %c749_i32_24 dim 1 : vector<8x768xf32>, i32 -> vector<8x768xf32>
    %55 = tpu.concatenate %47, %48, %49, %50, %45, %51, %52, %53, %54 in 0 : vector<8x768xf32>, vector<8x768xf32>, vector<8x768xf32>, vector<8x768xf32>, vector<8x768xf32>, vector<8x768xf32>, vector<8x768xf32>, vector<8x768xf32>, vector<8x768xf32> -> vector<72x768xf32>
    %cst_25 = arith.constant dense<0.000000e+00> : vector<4x768xf32>
    %56 = tpu.matmul %46, %55, %cst_25 {dimension_numbers = #tpu.dot_dimension_numbers<[1], [0], [0], [1], [0, 0, 1, 1], [], []>} : vector<4x72xf32>, vector<72x768xf32>, vector<4x768xf32> -> vector<4x768xf32>
    %c0_26 = arith.constant 0 : index
    %c0_27 = arith.constant 0 : index
    %57 = vector.load %arg4[%c0_26, %c0_27] : memref<4x72xf32, #tpu.memory_space<vmem>>, vector<4x72xf32>
    %cst_28 = arith.constant dense<0.000000e+00> : vector<4x768xf32>
    %58 = tpu.matmul %57, %12, %cst_28 {dimension_numbers = #tpu.dot_dimension_numbers<[1], [0], [0], [1], [0, 0, 1, 1], [], []>} : vector<4x72xf32>, vector<72x768xf32>, vector<4x768xf32> -> vector<4x768xf32>
    %59 = arith.addf %56, %58 : vector<4x768xf32>
    %60 = vector.extract_strided_slice %2 {offsets = [0, 0], sizes = [4, 1], strides = [1, 1]} : vector<8x1xf32> to vector<4x1xf32>
    %61 = vector.extract_strided_slice %3 {offsets = [0, 0], sizes = [4, 1], strides = [1, 1]} : vector<8x1xf32> to vector<4x1xf32>
    %62 = vector.broadcast %1 : vector<1x768xf32> to vector<4x768xf32>
    %63 = arith.mulf %59, %62 : vector<4x768xf32>
    %cst_29 = arith.constant dense<0.000000e+00> : vector<4xf32>
    %64 = vector.multi_reduction <add>, %63, %cst_29 [1] : vector<4x768xf32> to vector<4xf32>
    %65 = vector.shape_cast %64 : vector<4xf32> to vector<4x1xf32>
    %cst_30 = arith.constant 0.001953125 : f32
    %66 = vector.broadcast %cst_30 : f32 to vector<4x1xf32>
    %67 = arith.mulf %65, %66 : vector<4x1xf32>
    %68 = vector.broadcast %67 : vector<4x1xf32> to vector<4x768xf32>
    %69 = arith.subf %59, %68 : vector<4x768xf32>
    %70 = vector.broadcast %1 : vector<1x768xf32> to vector<4x768xf32>
    %71 = arith.mulf %69, %70 : vector<4x768xf32>
    %72 = arith.mulf %71, %71 : vector<4x768xf32>
    %cst_31 = arith.constant dense<0.000000e+00> : vector<4xf32>
    %73 = vector.multi_reduction <add>, %72, %cst_31 [1] : vector<4x768xf32> to vector<4xf32>
    %74 = vector.shape_cast %73 : vector<4xf32> to vector<4x1xf32>
    %cst_32 = arith.constant 0.001953125 : f32
    %75 = vector.broadcast %cst_32 : f32 to vector<4x1xf32>
    %76 = arith.mulf %74, %75 : vector<4x1xf32>
    %cst_33 = arith.constant 9.99999974E-6 : f32
    %77 = vector.broadcast %cst_33 : f32 to vector<4x1xf32>
    %78 = arith.addf %76, %77 : vector<4x1xf32>
    %79 = math.rsqrt %78 : vector<4x1xf32>
    %80 = vector.broadcast %79 : vector<4x1xf32> to vector<4x768xf32>
    %81 = arith.mulf %71, %80 : vector<4x768xf32>
    %82 = vector.broadcast %60 : vector<4x1xf32> to vector<4x768xf32>
    %83 = arith.mulf %81, %82 : vector<4x768xf32>
    %84 = vector.broadcast %61 : vector<4x1xf32> to vector<4x768xf32>
    %85 = arith.addf %83, %84 : vector<4x768xf32>
    %cst_34 = arith.constant 0.000000e+00 : f32
    %86 = vector.broadcast %cst_34 : f32 to vector<4x768xf32>
    %87 = arith.cmpf oge, %85, %86 : vector<4x768xf32>
    %cst_35 = arith.constant 0.00999999977 : f32
    %88 = vector.broadcast %cst_35 : f32 to vector<4x768xf32>
    %89 = arith.mulf %88, %85 : vector<4x768xf32>
    %90 = arith.select %87, %85, %89 : vector<4x768xi1>, vector<4x768xf32>
    %91 = vector.broadcast %1 : vector<1x768xf32> to vector<4x768xf32>
    %92 = arith.mulf %90, %91 : vector<4x768xf32>
    %c0_36 = arith.constant 0 : index
    %c0_37 = arith.constant 0 : index
    %93 = vector.load %arg7[%c0_36, %c0_37] : memref<4x768xf32, #tpu.memory_space<vmem>>, vector<4x768xf32>
    tpu.vector_store %arg7[%c0_36, %c0_37], %92 {strides = array<i32>} : memref<4x768xf32, #tpu.memory_space<vmem>>, vector<4x768xf32>,
    %c767_i32_38 = arith.constant 767 : i32
    %94 = tpu.dynamic_rotate %92 by %c767_i32_38 dim 1 : vector<4x768xf32>, i32 -> vector<4x768xf32>
    %95 = arith.maximumf %92, %94 : vector<4x768xf32>
    %c750_i32_39 = arith.constant 750 : i32
    %96 = tpu.dynamic_rotate %92 by %c750_i32_39 dim 1 : vector<4x768xf32>, i32 -> vector<4x768xf32>
    %c749_i32_40 = arith.constant 749 : i32
    %97 = tpu.dynamic_rotate %92 by %c749_i32_40 dim 1 : vector<4x768xf32>, i32 -> vector<4x768xf32>
    %98 = arith.maximumf %96, %97 : vector<4x768xf32>
    %99 = arith.maximumf %95, %98 : vector<4x768xf32>
    %c0_41 = arith.constant 0 : index
    %c0_42 = arith.constant 0 : index
    %100 = vector.load %arg8[%c0_41, %c0_42] : memref<4x768xf32, #tpu.memory_space<vmem>>, vector<4x768xf32>
    tpu.vector_store %arg8[%c0_41, %c0_42], %99 {strides = array<i32>} : memref<4x768xf32, #tpu.memory_space<vmem>>, vector<4x768xf32>,
    return
  }
  func.func @transform_0(%arg0: i32) -> (i32, i32) {
    %c0_i32 = arith.constant 0 : i32
    %c0_i32_0 = arith.constant 0 : i32
    %c0_i32_1 = arith.constant 0 : i32
    return %c0_i32, %c0_i32_0 : i32, i32
  }
  func.func @transform_1(%arg0: i32) -> (i32, i32) {
    %c0_i32 = arith.constant 0 : i32
    %c0_i32_0 = arith.constant 0 : i32
    %c0_i32_1 = arith.constant 0 : i32
    return %c0_i32, %c0_i32_0 : i32, i32
  }
  func.func @transform_2(%arg0: i32) -> (i32, i32) {
    %c0_i32 = arith.constant 0 : i32
    %c0_i32_0 = arith.constant 0 : i32
    %c0_i32_1 = arith.constant 0 : i32
    return %c0_i32, %c0_i32_0 : i32, i32
  }
  func.func @transform_3(%arg0: i32) -> (i32, i32) {
    %c0_i32 = arith.constant 0 : i32
    %c0_i32_0 = arith.constant 0 : i32
    %c0_i32_1 = arith.constant 0 : i32
    return %c0_i32, %c0_i32_0 : i32, i32
  }
  func.func @transform_4(%arg0: i32) -> (i32, i32) {
    %c0_i32 = arith.constant 0 : i32
    %c0_i32_0 = arith.constant 0 : i32
    %c0_i32_1 = arith.constant 0 : i32
    return %c0_i32, %c0_i32_0 : i32, i32
  }
  func.func @transform_5(%arg0: i32) -> (i32, i32) {
    %c0_i32 = arith.constant 0 : i32
    %c0_i32_0 = arith.constant 0 : i32
    %c0_i32_1 = arith.constant 0 : i32
    return %c0_i32, %c0_i32_0 : i32, i32
  }
  func.func @transform_6(%arg0: i32) -> (i32, i32) {
    %c0_i32 = arith.constant 0 : i32
    %c0_i32_0 = arith.constant 0 : i32
    %c0_i32_1 = arith.constant 0 : i32
    return %c0_i32, %c0_i32_0 : i32, i32
  }
  func.func @transform_7(%arg0: i32) -> (i32, i32) {
    %c0_i32 = arith.constant 0 : i32
    %c0_i32_0 = arith.constant 0 : i32
    %c0_i32_1 = arith.constant 0 : i32
    return %c0_i32, %c0_i32_0 : i32, i32
  }
}

</mosaic_0001>

<bundles_post_ra>
// kernel: dense_down_layer_first.1
= control target key start
LH: loop header
LB: loop body
LE: loop exit
PB: predicated region body
PF: predicated region fallthrough
CT: control target
= control target key end

     0   :  { %s1671_s9 = smov 19   ;;  %s1672_s10 = smov 18   ;;  %v1678_v10 = vmov 0.0   ;;  %v45_v11 = vlaneseq  ;;  %vm188_vm8 = vcmask 588800   ;;  %vm1113_vm15 = vcmask 1043456   ;;  %s2625_s0 = inlined_call_operand.vmem [shape: f32[8,768], index: 0, kind: input, shape index: {}]   ;;  %s2626_s1 = inlined_call_operand.vmem [shape: f32[8,72], index: 1, kind: input, shape index: {}]   ;;  %s2627_s3 = inlined_call_operand.vmem [shape: f32[4,72], index: 3, kind: input, shape index: {}]   ;;  %s2628_s5 = inlined_call_operand.vmem [shape: f32[1,768], index: 5, kind: input, shape index: {}]   ;;  %s2629_s4 = inlined_call_operand.vmem [shape: f32[8,2], index: 4, kind: input, shape index: {}]   ;;  %s2630_s2 = inlined_call_operand.vmem [shape: f32[4,72], index: 2, kind: input, shape index: {}]   ;;  %s2631_s6 = inlined_call_operand.vmem [shape: f32[4,768], index: 6, kind: output, shape index: {0}]   ;;  %s2632_s7 = inlined_call_operand.vmem [shape: f32[4,768], index: 7, kind: output, shape index: {1}]  }
   0x1   :  { %v1725_v0 = vld [vmem:[%s2625_s0 + $0x10] sm:$0xff]  ;;  %v1730_v1 = vld [vmem:[%s2625_s0 + $0x28] sm:$0xff]  ;;  %v1735_v2 = vld [vmem:[%s2625_s0] sm:$0xff]  ;;  %s1673_s11 = smov 1   ;;  %s1674_s12 = smov 17   ;;  %256 = vmatprep.mubr.f32.mxu0 %v1678_v10  ;;  %327 = vmatprep.mubr.f32.mxu1 %v1678_v10 }
   0x2   :  { %v1494_v3 = vpack.i.bf16 %v1725_v0, %v1730_v1  ;;  %v1742_v4 = vld [vmem:[%s2625_s0 + $0x8] sm:$0xff]  ;;  %s1675_s13 = smov 127   ;;  %s1676_s14 = smov 110   ;;  %v1764_v7 = vld [vmem:[%s2625_s0 + $0x18] sm:$0xff]  ;;  %v1769_v8 = vld [vmem:[%s2625_s0 + $0x20] sm:$0xff]  ;;  %v1809_v14 = vand.u32 127, %v45_v11 }
   0x3   :  { %v1484_v5 = vpack.i.bf16 %v1742_v4, %v1735_v2  ;;  %v1524_v6 = vpack.i.bf16 %v1725_v0, %v1742_v4  ;;  %s1677_s15 = smov 111   ;;  %v1544_v9 = vpack.i.bf16 %v1769_v8, %v1764_v7  ;;  %s1679_s0 = smov 109  }
   0x4   :  { %1495 = vrot.lane.b32.xlu1 %v1494_v3, %s1671_s9  ;;  %vm47_vm0 = vcmp.lt.s32.totalorder %v1809_v14, 19  ;;  %vm66_vm1 = vcmp.lt.s32.totalorder %v1809_v14, 18  ;;  %vm85_vm2 = vcmp.lt.s32.totalorder %v1809_v14, 17  ;;  %vm104_vm3 = vcmp.lt.s32.totalorder %v1809_v14, 1 }
   0x5   :  { %1485 = vrot.lane.b32.xlu0 %v1484_v5, %s1671_s9  ;;  %vm123_vm4 = vcmp.lt.s32.totalorder %v1809_v14, 127  ;;  %vm161_vm5 = vcmp.lt.s32.totalorder %v1809_v14, 110  ;;  %vm142_vm6 = vcmp.lt.s32.totalorder %v1809_v14, 111  ;;  %vm180_vm7 = vcmp.lt.s32.totalorder %v1809_v14, 109 }
   0x8   :  { %1500 = vrot.lane.b32.xlu1 %v1494_v3, %s1672_s10 }
   0x9   :  { %1490 = vrot.lane.b32.xlu0 %v1484_v5, %s1672_s10 }
   0xc   :  { %1510 = vrot.lane.b32.xlu1 %v1484_v5, %s1673_s11 }
   0xd   :  { %1505 = vrot.lane.b32.xlu0 %v1484_v5, %s1674_s12 }
  0x10   :  { %1520 = vrot.lane.b32.xlu1 %v1494_v3, %s1673_s11 }
  0x11   :  { %1515 = vrot.lane.b32.xlu0 %v1494_v3, %s1674_s12 }
  0x14   :  { %111 = vrot.lane.b32.xlu1 %v1735_v2, %s1675_s13 }
  0x15   :  { %1525 = vrot.lane.b32.xlu0 %v1524_v6, %s1675_s13 }
  0x18   :  { %1535 = vrot.lane.b32.xlu1 %v1524_v6, %s1676_s14 }
  0x19   :  { %1530 = vrot.lane.b32.xlu0 %v1524_v6, %s1677_s15 }
  0x1c   :  { %149 = vrot.lane.b32.xlu1 %v1735_v2, %s1676_s14 }
  0x1d   :  { %130 = vrot.lane.b32.xlu0 %v1735_v2, %s1677_s15 }
  0x20   :  { %1545 = vrot.lane.b32.xlu1 %v1544_v9, %s1672_s10 }
  0x21   :  { %1540 = vrot.lane.b32.xlu0 %v1544_v9, %s1671_s9 }
  0x24   :  { %1555 = vrot.lane.b32.xlu1 %v1544_v9, %s1673_s11 }
  0x25   :  { %1550 = vrot.lane.b32.xlu0 %v1544_v9, %s1674_s12 }
  0x28   :  { %172 = vrot.lane.b32.xlu1 %v1725_v0, %s1679_s0 }
  0x29   :  { %170 = vrot.lane.b32.xlu0 %v1742_v4, %s1679_s0 }
  0x2c   :  { %1560 = vrot.lane.b32.xlu1 %v1544_v9, %s1675_s13 }
  0x2d   :  { %168 = vrot.lane.b32.xlu0 %v1735_v2, %s1679_s0 }
  0x30   :  { %1565 = vrot.lane.b32.xlu1 %v1544_v9, %s1677_s15 }
  0x31   :  { %121 = vrot.lane.b32.xlu0 %v1730_v1, %s1675_s13 }
  0x34   :  { %140 = vrot.lane.b32.xlu1 %v1730_v1, %s1677_s15 }
  0x35   :  { %1570 = vrot.lane.b32.xlu0 %v1544_v9, %s1676_s14 }
  0x38   :  { %174 = vrot.lane.b32.xlu1 %v1764_v7, %s1679_s0 }
  0x39   :  { %159 = vrot.lane.b32.xlu0 %v1730_v1, %s1676_s14 }
  0x3c   :  { %178 = vrot.lane.b32.xlu1 %v1730_v1, %s1679_s0 }
  0x3d   :  { %176 = vrot.lane.b32.xlu0 %v1769_v8, %s1679_s0 }
  0x76   :  { %v1804_v12 = vpop.permute.xlu1 %1495 }
  0x77   :  { %v1806_v13 = vpop.permute.xlu0 %1485  ;;  %v1497_v15 = vunpack.i.l.bf16 %v1804_v12  ;;  %v1498_v9 = vunpack.i.h.bf16 %v1804_v12 }
  0x78   :  { %v1488_v16 = vunpack.i.h.bf16 %v1806_v13  ;;  %v1487_v17 = vunpack.i.l.bf16 %v1806_v13 }
  0x7a   :  { %v1814_v18 = vpop.permute.xlu1 %1500  ;;  %v52_v24 = vsel %vm47_vm0, %v1487_v17, %v1488_v16  ;;  %v53_v26 = vsel %vm47_vm0, %v1497_v15, %v1487_v17 }
  0x7b   :  { %v1502_v19 = vunpack.i.l.bf16 %v1814_v18  ;;  %v1817_v20 = vpop.permute.xlu0 %1490 }
  0x7c   :  { %v1493_v21 = vunpack.i.h.bf16 %v1817_v20  ;;  %v1492_v22 = vunpack.i.l.bf16 %v1817_v20 }
  0x7e   :  { %v1825_v23 = vpop.permute.xlu1 %1510  ;;  %v71_v25 = vsel %vm66_vm1, %v1492_v22, %v1493_v21  ;;  %v72_v27 = vsel %vm66_vm1, %v1502_v19, %v1492_v22 }
  0x7f   :  { %v1513_v28 = vunpack.i.h.bf16 %v1825_v23  ;;  %v1512_v29 = vunpack.i.l.bf16 %v1825_v23  ;;  %v1845_v30 = vpop.permute.xlu0 %1505  ;;  %v1847_v31 = vpack.c.bf16 %v71_v25, %v52_v24  ;;  %v1849_v32 = vpack.c.bf16 %v72_v27, %v53_v26 }
  0x80   :  { %v1508_v33 = vunpack.i.h.bf16 %v1845_v30  ;;  %v1507_v34 = vunpack.i.l.bf16 %v1845_v30 }
  0x81   :  { %1324 = vmatprep.subr.bf16.mxu0 %v1847_v31  ;;  %v109_v35 = vsel %vm104_vm3, %v1512_v29, %v1513_v28 }
  0x82   :  { %1326 = vmatpush1.bf16.msra.mxu0 %v1849_v32  ;;  %v1859_v36 = vpop.permute.xlu1 %1520  ;;  %v90_v37 = vsel %vm85_vm2, %v1507_v34, %v1508_v33 }
  0x83   :  { %v1522_v38 = vunpack.i.l.bf16 %v1859_v36  ;;  %v1866_v39 = vpop.permute.xlu0 %1515  ;;  %v1868_v40 = vpack.c.bf16 %v109_v35, %v90_v37  ;;  %v1523_v25 = vunpack.i.h.bf16 %v1859_v36 }
  0x84   :  { %v1517_v41 = vunpack.i.l.bf16 %v1866_v39  ;;  %v1518_v26 = vunpack.i.h.bf16 %v1866_v39 }
  0x85   :  { %1328 = vmatprep.subr.bf16.mxu0 %v1868_v40  ;;  %v110_v42 = vsel %vm104_vm3, %v1522_v38, %v1512_v29 }
  0x86   :  { %v1876_v43 = vpop.permute.xlu1 %111  ;;  %v91_v44 = vsel %vm85_vm2, %v1517_v41, %v1507_v34  ;;  %v89_v13 = vsel %vm85_vm2, %v1508_v33, %v1518_v26 }
  0x87   :  { %v1882_v45 = vpop.permute.xlu0 %1525  ;;  %v1884_v46 = vpack.c.bf16 %v110_v42, %v91_v44 }
  0x88   :  { %v1528_v47 = vunpack.i.h.bf16 %v1882_v45  ;;  %v1527_v48 = vunpack.i.l.bf16 %v1882_v45 }
  0x89   :  { %1330 = vmatpush1.bf16.msra.mxu0 %v1884_v46 }
  0x8a   :  { %v1890_v49 = vpop.permute.xlu1 %1535  ;;  %v127_v50 = vsel %vm123_vm4, %v1527_v48, %v1528_v47  ;;  %v128_v51 = vsel %vm123_vm4, %v1876_v43, %v1527_v48  ;;  %v51_v48 = vsel %vm47_vm0, %v1488_v16, %v1498_v9  ;;  %v108_v16 = vsel %vm104_vm3, %v1513_v28, %v1523_v25 }
  0x8b   :  { %v1538_v52 = vunpack.i.h.bf16 %v1890_v49  ;;  %v1537_v53 = vunpack.i.l.bf16 %v1890_v49  ;;  %v1903_v54 = vpop.permute.xlu0 %1530  ;;  %v1906_v55 = vpack.c.bf16 %v127_v50, %v1742_v4  ;;  %v1909_v56 = vpack.c.bf16 %v128_v51, %v1735_v2 }
  0x8c   :  { %v1533_v57 = vunpack.i.h.bf16 %v1903_v54  ;;  %v1532_v58 = vunpack.i.l.bf16 %v1903_v54  ;;  %v1503_v4 = vunpack.i.h.bf16 %v1814_v18  ;;  %v1985_v28 = vpack.c.bf16 %v108_v16, %v89_v13 }
  0x8d   :  { %1332 = vmatprep.subr.bf16.mxu0 %v1906_v55  ;;  %v165_v59 = vsel %vm161_vm5, %v1537_v53, %v1538_v52 }
  0x8e   :  { %1334 = vmatpush1.bf16.msra.mxu0 %v1909_v56  ;;  %v1919_v60 = vpop.permute.xlu1 %149  ;;  %v146_v61 = vsel %vm142_vm6, %v1532_v58, %v1533_v57  ;;  %v70_v29 = vsel %vm66_vm1, %v1493_v21, %v1503_v4 }
  0x8f   :  { %v166_v62 = vsel %vm161_vm5, %v1919_v60, %v1537_v53  ;;  %v1928_v63 = vpop.permute.xlu0 %130  ;;  %v1930_v2 = vpack.c.bf16 %v165_v59, %v146_v61  ;;  %v1957_v53 = vpack.c.bf16 %v70_v29, %v51_v48 }
  0x90   :  { %v147_v3 = vsel %vm142_vm6, %v1928_v63, %v1532_v58 }
  0x91   :  { %v1936_v5 = vpack.c.bf16 %v166_v62, %v147_v3  ;;  %1336 = vmatprep.subr.bf16.mxu0 %v1930_v2 }
  0x92   :  { %v1546_v6 = vpop.permute.xlu1 %1545 }
  0x93   :  { %v1547_v17 = vunpack.i.l.bf16 %v1546_v6  ;;  %v1541_v22 = vpop.permute.xlu0 %1540  ;;  %1338 = vmatpush1.bf16.msra.mxu0 %v1936_v5  ;;  %v1548_v50 = vunpack.i.h.bf16 %v1546_v6 }
  0x94   :  { %v1542_v24 = vunpack.i.l.bf16 %v1541_v22  ;;  %v1543_v20 = vunpack.i.h.bf16 %v1541_v22 }
  0x95   :  { %v69_v27 = vsel %vm66_vm1, %v1503_v4, %v1547_v17  ;;  %v68_v30 = vsel %vm66_vm1, %v1547_v17, %v1548_v50 }
  0x96   :  { %v1556_v34 = vpop.permute.xlu1 %1555  ;;  %v50_v35 = vsel %vm47_vm0, %v1498_v9, %v1542_v24  ;;  %v49_v33 = vsel %vm47_vm0, %v1542_v24, %v1543_v20  ;;  %v48_v6 = vsel %vm47_vm0, %v1543_v20, %v1497_v15  ;;  %v67_v9 = vsel %vm66_vm1, %v1548_v50, %v1502_v19 }
  0x97   :  { %v1557_v37 = vunpack.i.l.bf16 %v1556_v34  ;;  %v1551_v42 = vpop.permute.xlu0 %1550  ;;  %v1951_v44 = vpack.c.bf16 %v69_v27, %v50_v35  ;;  %v1558_v61 = vunpack.i.h.bf16 %v1556_v34  ;;  %v2013_v18 = vpack.c.bf16 %v68_v30, %v49_v33 }
  0x98   :  { %v1552_v51 = vunpack.i.l.bf16 %v1551_v42  ;;  %v1553_v62 = vunpack.i.h.bf16 %v1551_v42  ;;  %v2019_v27 = vpack.c.bf16 %v67_v9, %v48_v6 }
  0x99   :  { %1340 = vmatprep.subr.bf16.mxu1 %v1951_v44  ;;  %v107_v21 = vsel %vm104_vm3, %v1523_v25, %v1557_v37  ;;  %v105_v15 = vsel %vm104_vm3, %v1558_v61, %v1522_v38  ;;  %v106_v29 = vsel %vm104_vm3, %v1557_v37, %v1558_v61 }
  0x9a   :  { %1342 = vmatpush1.bf16.msra.mxu1 %v1957_v53  ;;  %v1972_v58 = vpop.permute.xlu1 %172  ;;  %v88_v59 = vsel %vm85_vm2, %v1518_v26, %v1552_v51  ;;  %v2003_v26 = vld [vmem:[%s2626_s1] sm:$0xff]  ;;  %v86_v12 = vsel %vm85_vm2, %v1553_v62, %v1517_v41  ;;  %v87_v39 = vsel %vm85_vm2, %v1552_v51, %v1553_v62 }
  0x9b   :  { %v171_v3 = vpop.permute.xlu0 %170  ;;  %v1976_v4 = vpack.c.bf16 %v107_v21, %v88_v59  ;;  %v2035_v34 = vpack.c.bf16 %v105_v15, %v86_v12  ;;  %v2047_v48 = vpack.c.bf16 %v106_v29, %v87_v39 }
  0x9c   :  { %v1983_v23 = vsel %vm180_vm7, %v171_v3, %v1972_v58 }
  0x9d   :  { %208 = vmatprep.subr.mxu0 %v1983_v23  ;;  %1344 = vmatprep.subr.bf16.mxu1 %v1976_v4 }
  0x9e   :  { %1346 = vmatpush1.bf16.msra.mxu1 %v1985_v28  ;;  %v1561_v17 = vpop.permute.xlu1 %1560 }
  0x9f   :  { %v1563_v22 = vunpack.i.h.bf16 %v1561_v17  ;;  %v1562_v24 = vunpack.i.l.bf16 %v1561_v17  ;;  %v169_v25 = vpop.permute.xlu0 %168 }
  0xa0   :  { %v2017_v19 = vsel %vm180_vm7, %v169_v25, %v171_v3 }
  0xa1   :  { %209 = vmatpush1.msra.mxu0 %v2017_v19  ;;  %v125_v36 = vsel %vm123_vm4, %v1562_v24, %v1563_v22  ;;  %v126_v38 = vsel %vm123_vm4, %v1528_v47, %v1562_v24 }
  0xa2   :  { %1356 = vmatprep.subr.bf16.mxu0 %v2019_v27  ;;  %v1566_v41 = vpop.permute.xlu1 %1565  ;;  %1314 = vmatmul.mubr.msk.f32.vlgmr.msra.gmra.mrb[0].mxu0 %vm188_vm8, %v2003_v26  ;;  %v1347_v35 = vpack.c.bf16 %v125_v36, %v1764_v7  ;;  %v2039_v37 = vpack.c.bf16 %v126_v38, %v1725_v0 }
  0xa3   :  { %v122_v42 = vpop.permute.xlu0 %121  ;;  %1358 = vmatpush1.bf16.msra.mxu0 %v2013_v18  ;;  %398 = vmatprep.mubr.f32.mxu0 %v1678_v10  ;;  %v1568_v45 = vunpack.i.h.bf16 %v1566_v41  ;;  %v1567_v0 = vunpack.i.l.bf16 %v1566_v41 }
  0xa4   :  { %v129_v47 = vsel %vm123_vm4, %v122_v42, %v1876_v43  ;;  %1360 = vmatprep.subr.bf16.mxu0 %v2035_v34  ;;  %1348 = vmatprep.subr.bf16.mxu1 %v1347_v35  ;;  %v124_v50 = vsel %vm123_vm4, %v1563_v22, %v122_v42 }
  0xa5   :  { %v2050_v7 = vpack.c.bf16 %v129_v47, %v1730_v1  ;;  %1350 = vmatpush1.bf16.msra.mxu1 %v2039_v37  ;;  %v144_v13 = vsel %vm142_vm6, %v1567_v0, %v1568_v45  ;;  %v2060_v1 = vpack.c.bf16 %v124_v50, %v1769_v8  ;;  %v145_v61 = vsel %vm142_vm6, %v1533_v57, %v1567_v0 }
  0xa6   :  { %v141_v51 = vpop.permute.xlu1 %140  ;;  %v1680_v47 = vmov 0  }
  0xa7   :  { %v1571_v20 = vpop.permute.xlu0 %1570  ;;  %1362 = vmatpush1.bf16.msra.mxu0 %v2047_v48  ;;  %v143_v33 = vsel %vm142_vm6, %v1568_v45, %v141_v51  ;;  %v148_v54 = vsel %vm142_vm6, %v141_v51, %v1928_v63  ;;  %1574 = vset.pattern.permute.xlu0 %v1680_v47 }
  0xa8   :  { %v1573_v21 = vunpack.i.h.bf16 %v1571_v20  ;;  %v1572_v43 = vunpack.i.l.bf16 %v1571_v20  ;;  %1364 = vmatprep.subr.bf16.mxu0 %v2050_v7 }
  0xaa   :  { %v175_v16 = vpop.permute.xlu1 %174  ;;  %v163_v59 = vsel %vm161_vm5, %v1572_v43, %v1573_v21  ;;  %v164_v62 = vsel %vm161_vm5, %v1538_v52, %v1572_v43 }
  0xab   :  { %v160_v3 = vpop.permute.xlu0 %159  ;;  %1366 = vmatpush1.bf16.msra.mxu0 %v2060_v1  ;;  %v1351_v30 = vpack.c.bf16 %v163_v59, %v144_v13  ;;  %v1353_v8 = vpack.c.bf16 %v164_v62, %v145_v61 }
  0xac   :  { %v162_v57 = vsel %vm161_vm5, %v1573_v21, %v160_v3  ;;  %v167_v49 = vsel %vm161_vm5, %v160_v3, %v1919_v60  ;;  %v183_v60 = vsel %vm180_vm7, %v1972_v58, %v175_v16 }
  0xad   :  { %v1367_v52 = vpack.c.bf16 %v167_v49, %v148_v54  ;;  %v1369_v6 = vpack.c.bf16 %v162_v57, %v143_v33  ;;  %1352 = vmatprep.subr.bf16.mxu1 %v1351_v30 }
  0xae   :  { %1354 = vmatpush1.bf16.msra.mxu1 %v1353_v8  ;;  %v179_v9 = vpop.permute.xlu1 %178 }
  0xaf   :  { %v177_v17 = vpop.permute.xlu0 %176  ;;  %1368 = vmatprep.subr.bf16.mxu0 %v1367_v52  ;;  %v186_v22 = vsel %vm180_vm7, %v179_v9, %v169_v25 }
  0xb0   :  { %1370 = vmatpush1.bf16.msra.mxu0 %v1369_v6  ;;  %v182_v63 = vsel %vm180_vm7, %v175_v16, %v177_v17  ;;  %v181_v24 = vsel %vm180_vm7, %v177_v17, %v179_v9 }
  0xb1   :  { %279 = vmatprep.subr.mxu1 %v182_v63  ;;  %350 = vmatprep.subr.mxu0 %v186_v22 }
  0xb2   :  { %280 = vmatpush1.msra.mxu1 %v183_v60 }
  0xb3   :  { %1315 = vmatmul.mubr.msk.f32.vlgmr.msra.gmra.mrb[0].mxu1 %vm188_vm8, %v2003_v26  ;;  %1372 = vmatprep.subr.bf16.mxu1 %v1847_v31  ;;  %v674_v31 = vld [vmem:[%s2627_s3] sm:$0xf] }
  0xb4   :  { %351 = vmatpush1.msra.mxu0 %v181_v24  ;;  %1374 = vmatpush1.bf16.msra.mxu1 %v1849_v32  ;;  %v407_v32 = vshrl.u32 %v45_v11, 7 }
  0xb5   :  { %1376 = vmatprep.subr.bf16.mxu1 %v1868_v40  ;;  %1388 = vmatprep.subr.bf16.mxu0 %v1951_v44 }
  0xb6   :  { %1316 = vmatmul.mubr.msk.f32.vlgmr.msra.gmra.mrb[2].mxu0 %vm188_vm8, %v2003_v26  ;;  %742 = vmatprep.mubr.f32.mxu1 %v1678_v10  ;;  %v408_v40 = vsub.s32 0, %v407_v32  ;;  %v424_v11 = vsub.s32 4, %v407_v32  ;;  %v428_v12 = vsub.s32 5, %v407_v32 }
  0xb7   :  { %1390 = vmatpush1.bf16.msra.mxu0 %v1957_v53  ;;  %813 = vmatprep.mubr.f32.mxu0 %v1678_v10 }
  0xb8   :  { %1392 = vmatprep.subr.bf16.mxu0 %v1976_v4  ;;  %1378 = vmatpush1.bf16.msra.mxu1 %v1884_v46  ;;  %v31_v46 = vld [vmem:[%s2628_s5] sm:$0x3f] }
  0xb9   :  { %1380 = vmatprep.subr.bf16.mxu1 %v1906_v55  ;;  %v412_v55 = vsub.s32 1, %v407_v32  ;;  %v2146_v38 = vrot.slane %v31_v46, %v428_v12 }
  0xbb   :  { %1394 = vmatpush1.bf16.msra.mxu0 %v1985_v28  ;;  %v420_v28 = vsub.s32 3, %v407_v32 }
  0xbc   :  { %1396 = vmatprep.subr.bf16.mxu0 %v1347_v35  ;;  %1382 = vmatpush1.bf16.msra.mxu1 %v1909_v56  ;;  %v2132_v56 = vrot.slane %v31_v46, %v408_v40 }
  0xbd   :  { %1384 = vmatprep.subr.bf16.mxu1 %v1930_v2  ;;  %v2134_v2 = vrot.slane %v31_v46, %v412_v55  ;;  %v2140_v26 = vrot.slane %v31_v46, %v420_v28 }
  0xbf   :  { %1398 = vmatpush1.bf16.msra.mxu0 %v2039_v37 }
  0xc0   :  { %1400 = vmatprep.subr.bf16.mxu0 %v1351_v30  ;;  %1386 = vmatpush1.bf16.msra.mxu1 %v1936_v5 }
  0xc1   :  { %694 = vmatprep.subr.mxu1 %v1983_v23  ;;  %v416_v23 = vsub.s32 2, %v407_v32 }
  0xc3   :  { %1402 = vmatpush1.bf16.msra.mxu0 %v1353_v8  ;;  %v2138_v25 = vrot.slane %v31_v46, %v416_v23 }
  0xc4   :  { %765 = vmatprep.subr.mxu0 %v182_v63  ;;  %695 = vmatpush1.msra.mxu1 %v2017_v19 }
  0xc5   :  { %1404 = vmatprep.subr.bf16.mxu1 %v2019_v27  ;;  %1317 = vmatmul.mubr.msk.f32.vlgmr.msra.gmra.mrb[2].mxu1 %vm188_vm8, %v674_v31 }
  0xc6   :  { %1406 = vmatpush1.bf16.msra.mxu1 %v2013_v18  ;;  %884 = vmatprep.mubr.f32.mxu1 %v1678_v10  ;;  %v2142_v18 = vrot.slane %v31_v46, %v424_v11 }
  0xc7   :  { %766 = vmatpush1.msra.mxu0 %v183_v60  ;;  %1408 = vmatprep.subr.bf16.mxu1 %v2035_v34 }
  0xc8   :  { %1318 = vmatmul.mubr.msk.f32.vlgmr.msra.gmra.mrb[4].mxu0 %vm188_vm8, %v674_v31 }
  0xc9   :  { %1029 = vmatprep.mubr.f32.mxu0 %v1678_v10 }
  0xca   :  { %1410 = vmatpush1.bf16.msra.mxu1 %v2047_v48  ;;  %v32_v48 = vld [vmem:[%s2629_s4] sm:$0xff] }
  0xcb   :  { %1412 = vmatprep.subr.bf16.mxu1 %v2050_v7  ;;  %v1681_v7 = vmov 1  }
  0xcc   :  { %1575 = vset.pattern.permute.xlu1 %v1681_v7 }
  0xce   :  { %1414 = vmatpush1.bf16.msra.mxu1 %v2060_v1 }
  0xcf   :  { %1416 = vmatprep.subr.bf16.mxu1 %v1367_v52 }
  0xd2   :  { %1418 = vmatpush1.bf16.msra.mxu1 %v1369_v6 }
  0xd3   :  { %836 = vmatprep.subr.mxu1 %v186_v22 }
  0xd6   :  { %837 = vmatpush1.msra.mxu1 %v181_v24 }
  0xd7   :  { %1319 = vmatmul.mubr.msk.f32.vlgmr.msra.gmra.mrb[4].mxu1 %vm188_vm8, %v674_v31 }
  0xd8   :  { %958 = vmatprep.mubr.f32.mxu1 %v1678_v10 }
 0x175   :  { %v258_v5 = vpop.f32.mrb[0].mxu0 }
 0x176   :  { %v436_v44 = vmul.f32 %v2132_v56, %v258_v5  ;;  %v260_v53 = vpop.f32.mrb[1].mxu0 }
 0x177   :  { %v437_v58 = vmul.f32 %v2134_v2, %v260_v53 }
 0x179   :  { %v442_v4 = vadd.f32 %v437_v58, %v436_v44 }
 0x186   :  { %v329_v15 = vpop.f32.mrb[0].mxu1 }
 0x187   :  { %v438_v19 = vmul.f32 %v2138_v25, %v329_v15  ;;  %v331_v27 = vpop.f32.mrb[1].mxu1 }
 0x188   :  { %v439_v29 = vmul.f32 %v2140_v26, %v331_v27 }
 0x189   :  { %v443_v39 = vadd.f32 %v442_v4, %v438_v19  ;;  %v400_v36 = vpop.f32.mrb[2].mxu0 }
 0x18a   :  { %v440_v41 = vmul.f32 %v2142_v18, %v400_v36  ;;  %v402_v34 = vpop.f32.mrb[3].mxu0 }
 0x18b   :  { %v444_v35 = vadd.f32 %v443_v39, %v439_v29  ;;  %v441_v37 = vmul.f32 %v2146_v38, %v402_v34 }
 0x18d   :  { %v445_v42 = vadd.f32 %v444_v35, %v440_v41 }
 0x18f   :  { %v446_v45 = vadd.f32 %v445_v42, %v441_v37 }
 0x191   :  { %447 = vadd.xlane.f32.xlu0 %v446_v45 }
 0x1a7   :  { %486 = vperm.xlu0 %1574, %v32_v48  }
 0x1ab   :  { %1666 = vset.pattern.permute.xlu0 %v1681_v7 }
 0x21e   :  { %v448_v0 = vpop.xlane.xlu0 %447 }
 0x21f   :  { %v449_v50 = vmul.f32 0.001953125, %v448_v0 }
 0x221   :  { %v450_v51 = vsub.f32 %v258_v5, %v449_v50  ;;  %v451_v20 = vsub.f32 %v260_v53, %v449_v50  ;;  %v452_v21 = vsub.f32 %v329_v15, %v449_v50  ;;  %v453_v43 = vsub.f32 %v331_v27, %v449_v50 }
 0x222   :  { %v454_v13 = vsub.f32 %v400_v36, %v449_v50  ;;  %v455_v61 = vsub.f32 %v402_v34, %v449_v50 }
 0x223   :  { %v456_v1 = vmul.f32 %v450_v51, %v2132_v56  ;;  %v457_v16 = vmul.f32 %v451_v20, %v2134_v2  ;;  %v458_v59 = vmul.f32 %v452_v21, %v2138_v25  ;;  %v459_v62 = vmul.f32 %v453_v43, %v2140_v26 }
 0x224   :  { %v460_v8 = vmul.f32 %v454_v13, %v2142_v18  ;;  %v461_v57 = vmul.f32 %v455_v61, %v2146_v38 }
 0x225   :  { %v462_v3 = vmul.f32 %v456_v1, %v456_v1  ;;  %v463_v30 = vmul.f32 %v457_v16, %v457_v16  ;;  %v464_v33 = vmul.f32 %v458_v59, %v458_v59  ;;  %v465_v49 = vmul.f32 %v459_v62, %v459_v62 }
 0x226   :  { %v466_v6 = vmul.f32 %v460_v8, %v460_v8  ;;  %v467_v17 = vmul.f32 %v461_v57, %v461_v57  ;;  %v2159_v40 = vpop.permute.xlu0 %486 }
 0x227   :  { %v468_v54 = vadd.f32 %v463_v30, %v462_v3 }
 0x229   :  { %v469_v52 = vadd.f32 %v468_v54, %v464_v33 }
 0x22b   :  { %v470_v9 = vadd.f32 %v469_v52, %v465_v49 }
 0x22d   :  { %v471_v22 = vadd.f32 %v470_v9, %v466_v6 }
 0x22f   :  { %v472_v63 = vadd.f32 %v471_v22, %v467_v17 }
 0x231   :  { %473 = vadd.xlane.f32.xlu1 %v472_v63 }
 0x242   :  { %496 = vperm.xlu1 %1575, %v32_v48  }
 0x2be   :  { %v474_v60 = vpop.xlane.xlu1 %473 }
 0x2bf   :  { %v475_v24 = vmul.f32 0.001953125, %v474_v60 }
 0x2c1   :  { %v476_v31 = vadd.f32 1e-05, %v475_v24 }
 0x2c2   :  { %v2161_v53 = vpop.permute.xlu1 %496 }
 0x2c3   :  { %1667 = vrsqrt.f32 %v476_v31 }
 0x2cd   :  { %v1668_v32 = vpop.eup %1667 }
 0x2ce   :  { %v478_v46 = vmul.f32 %v1668_v32, %v456_v1  ;;  %v479_v55 = vmul.f32 %v1668_v32, %v457_v16  ;;  %v480_v5 = vmul.f32 %v1668_v32, %v458_v59  ;;  %v483_v44 = vmul.f32 %v1668_v32, %v461_v57 }
 0x2cf   :  { %v481_v27 = vmul.f32 %v1668_v32, %v459_v62  ;;  %v482_v29 = vmul.f32 %v1668_v32, %v460_v8 }
 0x2d0   :  { %v489_v58 = vmul.f32 %v2159_v40, %v478_v46  ;;  %v490_v4 = vmul.f32 %v2159_v40, %v479_v55  ;;  %v491_v23 = vmul.f32 %v2159_v40, %v480_v5  ;;  %v494_v28 = vmul.f32 %v2159_v40, %v483_v44 }
 0x2d1   :  { %v492_v48 = vmul.f32 %v2159_v40, %v481_v27  ;;  %v493_v7 = vmul.f32 %v2159_v40, %v482_v29 }
 0x2d2   :  { %v499_v11 = vadd.f32 %v2161_v53, %v489_v58  ;;  %v500_v12 = vadd.f32 %v2161_v53, %v490_v4  ;;  %v501_v15 = vadd.f32 %v2161_v53, %v491_v23  ;;  %v504_v19 = vadd.f32 %v2161_v53, %v494_v28 }
 0x2d3   :  { %v502_v43 = vadd.f32 %v2161_v53, %v492_v48  ;;  %v503_v13 = vadd.f32 %v2161_v53, %v493_v7 }
 0x2d4   :  { %vm505_vm9 = vcmp.ge.f32.partialorder %v499_v11, 0.0  ;;  %vm506_vm10 = vcmp.ge.f32.partialorder %v500_v12, 0.0  ;;  %vm507_vm11 = vcmp.ge.f32.partialorder %v501_v15, 0.0  ;;  %v511_v39 = vmul.f32 0.01, %v499_v11 }
 0x2d5   :  { %v512_v36 = vmul.f32 0.01, %v500_v12  ;;  %vm510_vm12 = vcmp.ge.f32.partialorder %v504_v19, 0.0  ;;  %v513_v41 = vmul.f32 0.01, %v501_v15  ;;  %vm508_vm13 = vcmp.ge.f32.partialorder %v502_v43, 0.0 }
 0x2d6   :  { %v516_v34 = vmul.f32 0.01, %v504_v19  ;;  %v517_v35 = vsel %vm505_vm9, %v499_v11, %v511_v39  ;;  %v514_v16 = vmul.f32 0.01, %v502_v43  ;;  %v515_v59 = vmul.f32 0.01, %v503_v13 }
 0x2d7   :  { %v518_v37 = vsel %vm506_vm10, %v500_v12, %v512_v36  ;;  %v519_v42 = vsel %vm507_vm11, %v501_v15, %v513_v41  ;;  %v2172_v45 = vmul.f32 %v517_v35, %v2132_v56  ;;  %vm509_vm14 = vcmp.ge.f32.partialorder %v503_v13, 0.0 }
 0x2d8   :  { %v2175_v47 = vmul.f32 %v518_v37, %v2134_v2  ;;  %v522_v0 = vsel %vm510_vm12, %v504_v19, %v516_v34  ;;  %v2180_v50 = vmul.f32 %v519_v42, %v2138_v25  ;;  %v520_v61 = vsel %vm508_vm13, %v502_v43, %v514_v16 }
 0x2d9   :  { %v2183_v51 = vmul.f32 %v522_v0, %v2146_v38  ;;  %v521_v62 = vsel %vm509_vm14, %v503_v13, %v515_v59  ;;  %v2201_v3 = vmul.f32 %v520_v61, %v2140_v26 }
 0x2da   :  { %v1576_v20 = vpack.i.bf16 %v2175_v47, %v2172_v45  ;;  %v1616_v1 = vpack.i.bf16 %v2180_v50, %v2175_v47  ;;  %v2204_v30 = vmul.f32 %v521_v62, %v2142_v18 }
 0x2db   :  { %v1606_v21 = vpack.i.bf16 %v2180_v50, %v2183_v51 }
 0x2dc   :  { %1577 = vrot.lane.b32.xlu1 %v1576_v20, %s1671_s9  ;;  %v1631_v8 = vpack.i.bf16 %v2204_v30, %v2201_v3 }
 0x2dd   :  { %1607 = vrot.lane.b32.xlu0 %v1606_v21, %s1674_s12 }
 0x2e0   :  { %1582 = vrot.lane.b32.xlu1 %v1576_v20, %s1672_s10 }
 0x2e1   :  { %1617 = vrot.lane.b32.xlu0 %v1616_v1, %s1675_s13 }
 0x2e4   :  { %1587 = vrot.lane.b32.xlu1 %v1606_v21, %s1671_s9 }
 0x2e5   :  { %1622 = vrot.lane.b32.xlu0 %v1616_v1, %s1677_s15 }
 0x2e8   :  { %1592 = vrot.lane.b32.xlu1 %v1606_v21, %s1672_s10 }
 0x2e9   :  { %620 = vrot.lane.b32.xlu0 %v2172_v45, %s1677_s15 }
 0x2ec   :  { %1597 = vrot.lane.b32.xlu1 %v1576_v20, %s1674_s12 }
 0x2ed   :  { %1632 = vrot.lane.b32.xlu0 %v1631_v8, %s1671_s9 }
 0x2f0   :  { %1602 = vrot.lane.b32.xlu1 %v1576_v20, %s1673_s11 }
 0x2f1   :  { %1642 = vrot.lane.b32.xlu0 %v1631_v8, %s1674_s12 }
 0x2f4   :  { %1612 = vrot.lane.b32.xlu1 %v1606_v21, %s1673_s11 }
 0x2f5   :  { %658 = vrot.lane.b32.xlu0 %v2175_v47, %s1679_s0 }
 0x2f8   :  { %602 = vrot.lane.b32.xlu1 %v2172_v45, %s1675_s13 }
 0x2f9   :  { %656 = vrot.lane.b32.xlu0 %v2172_v45, %s1679_s0 }
 0x2fc   :  { %1627 = vrot.lane.b32.xlu1 %v1616_v1, %s1676_s14 }
 0x2fd   :  { %612 = vrot.lane.b32.xlu0 %v2183_v51, %s1675_s13 }
 0x300   :  { %638 = vrot.lane.b32.xlu1 %v2172_v45, %s1676_s14 }
 0x301   :  { %1662 = vrot.lane.b32.xlu0 %v1631_v8, %s1676_s14 }
 0x304   :  { %1637 = vrot.lane.b32.xlu1 %v1631_v8, %s1672_s10 }
 0x305   :  { %648 = vrot.lane.b32.xlu0 %v2183_v51, %s1676_s14 }
 0x308   :  { %1647 = vrot.lane.b32.xlu1 %v1631_v8, %s1673_s11 }
 0x309   :  { %664 = vrot.lane.b32.xlu0 %v2204_v30, %s1679_s0 }
 0x30c   :  { %660 = vrot.lane.b32.xlu1 %v2180_v50, %s1679_s0 }
 0x310   :  { %1652 = vrot.lane.b32.xlu1 %v1631_v8, %s1675_s13 }
 0x314   :  { %1657 = vrot.lane.b32.xlu1 %v1631_v8, %s1677_s15 }
 0x318   :  { %630 = vrot.lane.b32.xlu1 %v2183_v51, %s1677_s15 }
 0x31c   :  { %662 = vrot.lane.b32.xlu1 %v2201_v3, %s1679_s0 }
 0x320   :  { %666 = vrot.lane.b32.xlu1 %v2183_v51, %s1679_s0 }
 0x34e   :  { %v2243_v33 = vpop.permute.xlu1 %1577 }
 0x34f   :  { %v2245_v54 = vpop.permute.xlu0 %1607  ;;  %v1580_v57 = vunpack.i.h.bf16 %v2243_v33  ;;  %v1579_v49 = vunpack.i.l.bf16 %v2243_v33 }
 0x350   :  { %v1609_v37 = vunpack.i.l.bf16 %v2245_v54 }
 0x351   :  { %v546_v22 = vsel %vm47_vm0, %v1579_v49, %v1580_v57 }
 0x352   :  { %v2249_v52 = vpop.permute.xlu1 %1582 }
 0x353   :  { %v1585_v6 = vunpack.i.h.bf16 %v2249_v52  ;;  %v1584_v9 = vunpack.i.l.bf16 %v2249_v52  ;;  %v2253_v17 = vpop.permute.xlu0 %1617 }
 0x354   :  { %v1620_v29 = vunpack.i.h.bf16 %v2253_v17  ;;  %v1619_v39 = vunpack.i.l.bf16 %v2253_v17 }
 0x355   :  { %v564_v63 = vsel %vm66_vm1, %v1584_v9, %v1585_v6 }
 0x356   :  { %v2263_v60 = vpop.permute.xlu1 %1587  ;;  %v1419_v24 = vpack.c.bf16 %v564_v63, %v546_v22  ;;  %v617_v48 = vsel %vm123_vm4, %v1619_v39, %v1620_v29 }
 0x357   :  { %v2265_v31 = vpop.permute.xlu0 %1622  ;;  %v1589_v32 = vunpack.i.l.bf16 %v2263_v60  ;;  %v1427_v1 = vpack.c.bf16 %v617_v48, %v2175_v47 }
 0x358   :  { %1420 = vmatprep.subr.bf16.mxu1 %v1419_v24  ;;  %v1625_v16 = vunpack.i.h.bf16 %v2265_v31  ;;  %v1624_v59 = vunpack.i.l.bf16 %v2265_v31 }
 0x359   :  { %v547_v5 = vsel %vm47_vm0, %v1589_v32, %v1579_v49 }
 0x35a   :  { %v2268_v46 = vpop.permute.xlu1 %1592  ;;  %v635_v47 = vsel %vm142_vm6, %v1624_v59, %v1625_v16 }
 0x35b   :  { %v1594_v55 = vunpack.i.l.bf16 %v2268_v46  ;;  %v2275_v44 = vpop.permute.xlu0 %620 }
 0x35c   :  { %v636_v24 = vsel %vm142_vm6, %v2275_v44, %v1624_v59 }
 0x35d   :  { %v565_v58 = vsel %vm66_vm1, %v1594_v55, %v1584_v9 }
 0x35e   :  { %v1421_v4 = vpack.c.bf16 %v565_v58, %v547_v5  ;;  %v2281_v23 = vpop.permute.xlu1 %1597  ;;  %v1595_v58 = vunpack.i.h.bf16 %v2268_v46  ;;  %v2392_v46 = vld [vmem:[%s2630_s2] sm:$0xf] }
 0x35f   :  { %v1600_v28 = vunpack.i.h.bf16 %v2281_v23  ;;  %v1599_v11 = vunpack.i.l.bf16 %v2281_v23  ;;  %v2287_v15 = vpop.permute.xlu0 %1632 }
 0x360   :  { %1422 = vmatpush1.bf16.msra.mxu1 %v1421_v4 }
 0x361   :  { %v582_v36 = vsel %vm85_vm2, %v1599_v11, %v1600_v28  ;;  %v583_v7 = vsel %vm85_vm2, %v1609_v37, %v1599_v11  ;;  %v1634_v11 = vunpack.i.l.bf16 %v2287_v15 }
 0x362   :  { %v2285_v12 = vpop.permute.xlu1 %1602 }
 0x363   :  { %v1605_v19 = vunpack.i.h.bf16 %v2285_v12  ;;  %v1604_v27 = vunpack.i.l.bf16 %v2285_v12  ;;  %v2311_v0 = vpop.permute.xlu0 %1642 }
 0x364   :  { %v1644_v48 = vunpack.i.l.bf16 %v2311_v0 }
 0x365   :  { %v600_v41 = vsel %vm104_vm3, %v1604_v27, %v1605_v19 }
 0x366   :  { %v2299_v34 = vpop.permute.xlu1 %1612  ;;  %v1423_v35 = vpack.c.bf16 %v600_v41, %v582_v36  ;;  %v563_v41 = vsel %vm66_vm1, %v1585_v6, %v1595_v58 }
 0x367   :  { %v1614_v42 = vunpack.i.l.bf16 %v2299_v34  ;;  %v659_v8 = vpop.permute.xlu0 %658 }
 0x368   :  { %1424 = vmatprep.subr.bf16.mxu1 %v1423_v35  ;;  %v1615_v35 = vunpack.i.h.bf16 %v2299_v34 }
 0x369   :  { %v601_v20 = vsel %vm104_vm3, %v1614_v42, %v1604_v27  ;;  %v1590_v27 = vunpack.i.h.bf16 %v2263_v60 }
 0x36a   :  { %v1425_v21 = vpack.c.bf16 %v601_v20, %v583_v7  ;;  %v2317_v43 = vpop.permute.xlu1 %602 }
 0x36b   :  { %v618_v13 = vsel %vm123_vm4, %v2317_v43, %v1619_v39  ;;  %v2348_v12 = vpop.permute.xlu0 %656  ;;  %v544_v20 = vsel %vm47_vm0, %v1590_v27, %v1634_v11  ;;  %v545_v52 = vsel %vm47_vm0, %v1580_v57, %v1590_v27 }
 0x36c   :  { %1426 = vmatpush1.bf16.msra.mxu1 %v1425_v21  ;;  %v1429_v61 = vpack.c.bf16 %v618_v13, %v2172_v45  ;;  %v1610_v13 = vunpack.i.h.bf16 %v2245_v54  ;;  %v1437_v59 = vpack.c.bf16 %v563_v41, %v545_v52 }
 0x36d   :  { %1428 = vmatprep.subr.bf16.mxu1 %v1427_v1 }
 0x36e   :  { %v2326_v62 = vpop.permute.xlu1 %1627  ;;  %v580_v33 = vsel %vm85_vm2, %v1610_v13, %v1644_v48 }
 0x36f   :  { %v1630_v49 = vunpack.i.h.bf16 %v2326_v62  ;;  %v1629_v9 = vunpack.i.l.bf16 %v2326_v62 }
 0x370   :  { %1430 = vmatpush1.bf16.msra.mxu1 %v1429_v61  ;;  %v1635_v61 = vunpack.i.h.bf16 %v2287_v15 }
 0x371   :  { %v653_v22 = vsel %vm161_vm5, %v1629_v9, %v1630_v49 }
 0x372   :  { %v2338_v63 = vpop.permute.xlu1 %638  ;;  %v1431_v45 = vpack.c.bf16 %v653_v22, %v635_v47 }
 0x373   :  { %v654_v5 = vsel %vm161_vm5, %v2338_v63, %v1629_v9  ;;  %v613_v9 = vpop.permute.xlu0 %612 }
 0x374   :  { %v1433_v4 = vpack.c.bf16 %v654_v5, %v636_v24  ;;  %1432 = vmatprep.subr.bf16.mxu1 %v1431_v45  ;;  %v599_v45 = vsel %vm104_vm3, %v1605_v19, %v1615_v35  ;;  %v1645_v24 = vunpack.i.h.bf16 %v2311_v0  ;;  %v581_v19 = vsel %vm85_vm2, %v1600_v28, %v1610_v13 }
 0x375   :  { %v543_v28 = vsel %vm47_vm0, %v1634_v11, %v1635_v61  ;;  %v619_v11 = vsel %vm123_vm4, %v613_v9, %v2317_v43 }
 0x376   :  { %v1638_v39 = vpop.permute.xlu1 %1637  ;;  %1434 = vmatpush1.bf16.msra.mxu1 %v1433_v4  ;;  %v1441_v4 = vpack.c.bf16 %v599_v45, %v581_v19  ;;  %v579_v54 = vsel %vm85_vm2, %v1644_v48, %v1645_v24  ;;  %v1459_v52 = vpack.c.bf16 %v619_v11, %v2183_v51 }
 0x377   :  { %v1639_v36 = vunpack.i.l.bf16 %v1638_v39  ;;  %v1640_v7 = vunpack.i.h.bf16 %v1638_v39  ;;  %v672_v39 = vsel %vm180_vm7, %v2348_v12, %v659_v8  ;;  %v1663_v41 = vpop.permute.xlu0 %1662 }
 0x379   :  { %v562_v21 = vsel %vm66_vm1, %v1595_v58, %v1639_v36  ;;  %v560_v15 = vsel %vm66_vm1, %v1640_v7, %v1594_v55  ;;  %v561_v0 = vsel %vm66_vm1, %v1639_v36, %v1640_v7  ;;  %v542_v55 = vsel %vm47_vm0, %v1635_v61, %v1589_v32 }
 0x37a   :  { %v1648_v1 = vpop.permute.xlu1 %1647  ;;  %v1435_v6 = vpack.c.bf16 %v562_v21, %v544_v20  ;;  %v1451_v36 = vpack.c.bf16 %v560_v15, %v542_v55  ;;  %v1453_v60 = vpack.c.bf16 %v561_v0, %v543_v28  ;;  %v578_v32 = vsel %vm85_vm2, %v1645_v24, %v1609_v37 }
 0x37b   :  { %v1650_v47 = vunpack.i.h.bf16 %v1648_v1  ;;  %v1649_v22 = vunpack.i.l.bf16 %v1648_v1  ;;  %v1664_v37 = vunpack.i.l.bf16 %v1663_v41  ;;  %v1665_v20 = vunpack.i.h.bf16 %v1663_v41 }
 0x37c   :  { %1436 = vmatprep.subr.bf16.mxu0 %v1435_v6 }
 0x37d   :  { %1438 = vmatpush1.bf16.msra.mxu0 %v1437_v59  ;;  %v598_v57 = vsel %vm104_vm3, %v1615_v35, %v1649_v22  ;;  %v596_v23 = vsel %vm104_vm3, %v1650_v47, %v1614_v42  ;;  %v597_v34 = vsel %vm104_vm3, %v1649_v22, %v1650_v47  ;;  %v652_v17 = vsel %vm161_vm5, %v1630_v49, %v1664_v37 }
 0x37e   :  { %v2384_v5 = vpop.permute.xlu1 %660  ;;  %v1439_v58 = vpack.c.bf16 %v598_v57, %v580_v33  ;;  %v1457_v21 = vpack.c.bf16 %v597_v34, %v579_v54  ;;  %v651_v62 = vsel %vm161_vm5, %v1664_v37, %v1665_v20 }
 0x37f   :  { %v671_v27 = vsel %vm180_vm7, %v659_v8, %v2384_v5  ;;  %v1455_v8 = vpack.c.bf16 %v596_v23, %v578_v32 }
 0x380   :  { %910 = vmatprep.subr.mxu1 %v671_v27  ;;  %1440 = vmatprep.subr.bf16.mxu0 %v1439_v58 }
 0x381   :  { %911 = vmatpush1.msra.mxu1 %v672_v39  ;;  %1442 = vmatpush1.bf16.msra.mxu0 %v1441_v4 }
 0x382   :  { %v1653_v42 = vpop.permute.xlu1 %1652  ;;  %1320 = vmatmul.mubr.msk.f32.vlgmr.msra.gmra.mrb[2].mxu1 %vm188_vm8, %v2392_v46  ;;  %1452 = vmatprep.subr.bf16.mxu1 %v1451_v36 }
 0x383   :  { %v1655_v35 = vunpack.i.h.bf16 %v1653_v42  ;;  %v1654_v7 = vunpack.i.l.bf16 %v1653_v42  ;;  %1454 = vmatpush1.bf16.msra.mxu1 %v1453_v60  ;;  %1100 = vmatprep.mubr.f32.mxu1 %v1678_v10 }
 0x384   :  { %1456 = vmatprep.subr.bf16.mxu1 %v1455_v8 }
 0x385   :  { %v616_v13 = vsel %vm123_vm4, %v1620_v29, %v1654_v7  ;;  %v615_v43 = vsel %vm123_vm4, %v1654_v7, %v1655_v35  ;;  %v614_v10 = vsel %vm123_vm4, %v1655_v35, %v613_v9  ;;  %v649_v29 = vpop.permute.xlu0 %648 }
 0x386   :  { %v1445_v1 = vpack.c.bf16 %v616_v13, %v2180_v50  ;;  %v1658_v48 = vpop.permute.xlu1 %1657  ;;  %v1443_v6 = vpack.c.bf16 %v615_v43, %v2201_v3  ;;  %v1461_v51 = vpack.c.bf16 %v614_v10, %v2204_v30  ;;  %v650_v22 = vsel %vm161_vm5, %v1665_v20, %v649_v29 }
 0x387   :  { %v1660_v59 = vunpack.i.h.bf16 %v1658_v48  ;;  %v1659_v61 = vunpack.i.l.bf16 %v1658_v48  ;;  %1458 = vmatpush1.bf16.msra.mxu1 %v1457_v21  ;;  %v655_v30 = vsel %vm161_vm5, %v649_v29, %v2338_v63 }
 0x388   :  { %1444 = vmatprep.subr.bf16.mxu0 %v1443_v6  ;;  %1460 = vmatprep.subr.bf16.mxu1 %v1459_v52 }
 0x389   :  { %v634_v50 = vsel %vm142_vm6, %v1625_v16, %v1659_v61  ;;  %1446 = vmatpush1.bf16.msra.mxu0 %v1445_v1  ;;  %v633_v3 = vsel %vm142_vm6, %v1659_v61, %v1660_v59  ;;  %v665_v33 = vpop.permute.xlu0 %664 }
 0x38a   :  { %v1449_v9 = vpack.c.bf16 %v652_v17, %v634_v50  ;;  %v631_v47 = vpop.permute.xlu1 %630  ;;  %v1447_v49 = vpack.c.bf16 %v651_v62, %v633_v3 }
 0x38b   :  { %v632_v31 = vsel %vm142_vm6, %v1660_v59, %v631_v47  ;;  %v637_v16 = vsel %vm142_vm6, %v631_v47, %v2275_v44  ;;  %1462 = vmatpush1.bf16.msra.mxu1 %v1461_v51 }
 0x38c   :  { %v1463_v45 = vpack.c.bf16 %v655_v30, %v637_v16  ;;  %v1465_v24 = vpack.c.bf16 %v650_v22, %v632_v31  ;;  %1448 = vmatprep.subr.bf16.mxu0 %v1447_v49 }
 0x38d   :  { %1450 = vmatpush1.bf16.msra.mxu0 %v1449_v9 }
 0x38e   :  { %v663_v57 = vpop.permute.xlu1 %662  ;;  %1464 = vmatprep.subr.bf16.mxu1 %v1463_v45 }
 0x38f   :  { %v670_v15 = vsel %vm180_vm7, %v2384_v5, %v663_v57  ;;  %1466 = vmatpush1.bf16.msra.mxu1 %v1465_v24  ;;  %v669_v63 = vsel %vm180_vm7, %v663_v57, %v665_v33 }
 0x390   :  { %981 = vmatprep.subr.mxu0 %v669_v63 }
 0x391   :  { %982 = vmatpush1.msra.mxu0 %v670_v15 }
 0x392   :  { %v667_v19 = vpop.permute.xlu1 %666  ;;  %1321 = vmatmul.mubr.msk.f32.vlgmr.msra.gmra.mrb[4].mxu0 %vm188_vm8, %v2392_v46 }
 0x393   :  { %v668_v44 = vsel %vm180_vm7, %v665_v33, %v667_v19  ;;  %v673_v0 = vsel %vm180_vm7, %v667_v19, %v2348_v12 }
 0x394   :  { %1052 = vmatprep.subr.mxu1 %v673_v0 }
 0x395   :  { %1053 = vmatpush1.msra.mxu1 %v668_v44 }
 0x396   :  { %1322 = vmatmul.mubr.msk.f32.vlgmr.msra.gmra.mrb[4].mxu1 %vm188_vm8, %v2392_v46 }
 0x455   :  { %v960_v5 = vpop.f32.mrb[2].mxu1 }
 0x456   :  { %v1107_v58 = vmul.f32 %v960_v5, %v2132_v56  ;;  %v962_v4 = vpop.f32.mrb[3].mxu1 }
 0x457   :  { %v1108_v27 = vmul.f32 %v962_v4, %v2134_v2 }
 0x458   :  { %v1114_v55 = vsel %vm1113_vm15, %v1107_v58, 0.0 }
 0x459   :  { %v1115_v23 = vsel %vm1113_vm15, %v1108_v27, 0.0 }
 0x45a   :  { %v1116_v28 = vadd.f32 %v1115_v23, %v1114_v55 }
 0x465   :  { %v1031_v39 = vpop.f32.mrb[4].mxu0 }
 0x466   :  { %v1109_v12 = vmul.f32 %v1031_v39, %v2138_v25  ;;  %v1033_v36 = vpop.f32.mrb[5].mxu0 }
 0x467   :  { %v1110_v41 = vmul.f32 %v1033_v36, %v2140_v26 }
 0x468   :  { %v1117_v46 = vsel %vm1113_vm15, %v1109_v12, 0.0 }
 0x469   :  { %v1118_v60 = vadd.f32 %v1117_v46, %v1116_v28  ;;  %v1119_v32 = vsel %vm1113_vm15, %v1110_v41, 0.0  ;;  %v1102_v34 = vpop.f32.mrb[4].mxu1 }
 0x46a   :  { %v1111_v42 = vmul.f32 %v1102_v34, %v2142_v18  ;;  %v1104_v8 = vpop.f32.mrb[5].mxu1 }
 0x46b   :  { %v1120_v11 = vadd.f32 %v1119_v32, %v1118_v60  ;;  %v1112_v35 = vmul.f32 %v1104_v8, %v2146_v38 }
 0x46c   :  { %v1121_v7 = vsel %vm1113_vm15, %v1111_v42, 0.0 }
 0x46d   :  { %v1122_v54 = vadd.f32 %v1121_v7, %v1120_v11  ;;  %v1123_v37 = vsel %vm1113_vm15, %v1112_v35, 0.0 }
 0x46f   :  { %v1124_v20 = vadd.f32 %v1123_v37, %v1122_v54 }
 0x471   :  { %1125 = vadd.xlane.f32.xlu0 %v1124_v20 }
 0x4fe   :  { %v1126_v21 = vpop.xlane.xlu0 %1125 }
 0x4ff   :  { %v1127_v13 = vmul.f32 0.001953125, %v1126_v21 }
 0x501   :  { %v1128_v43 = vsub.f32 %v960_v5, %v1127_v13  ;;  %v1129_v52 = vsub.f32 %v962_v4, %v1127_v13  ;;  %v1130_v10 = vsub.f32 %v1031_v39, %v1127_v13  ;;  %v1131_v1 = vsub.f32 %v1033_v36, %v1127_v13 }
 0x502   :  { %v1132_v48 = vsub.f32 %v1102_v34, %v1127_v13  ;;  %v1133_v6 = vsub.f32 %v1104_v8, %v1127_v13 }
 0x503   :  { %v1134_v59 = vmul.f32 %v1128_v43, %v2132_v56  ;;  %v1135_v61 = vmul.f32 %v1129_v52, %v2134_v2  ;;  %v1136_v17 = vmul.f32 %v1130_v10, %v2138_v25  ;;  %v1137_v29 = vmul.f32 %v1131_v1, %v2140_v26 }
 0x504   :  { %v1138_v51 = vmul.f32 %v1132_v48, %v2142_v18  ;;  %v1139_v9 = vmul.f32 %v1133_v6, %v2146_v38 }
 0x505   :  { %v1140_v50 = vmul.f32 %v1134_v59, %v1134_v59  ;;  %v1141_v3 = vmul.f32 %v1135_v61, %v1135_v61  ;;  %v1142_v62 = vmul.f32 %v1136_v17, %v1136_v17  ;;  %v1143_v47 = vmul.f32 %v1137_v29, %v1137_v29 }
 0x506   :  { %v1144_v31 = vmul.f32 %v1138_v51, %v1138_v51  ;;  %v1145_v24 = vmul.f32 %v1139_v9, %v1139_v9 }
 0x507   :  { %v1146_v49 = vsel %vm1113_vm15, %v1140_v50, 0.0  ;;  %v1147_v22 = vsel %vm1113_vm15, %v1141_v3, 0.0  ;;  %v1149_v16 = vsel %vm1113_vm15, %v1142_v62, 0.0  ;;  %v1151_v33 = vsel %vm1113_vm15, %v1143_v47, 0.0 }
 0x508   :  { %v1148_v30 = vadd.f32 %v1147_v22, %v1146_v49  ;;  %v1153_v15 = vsel %vm1113_vm15, %v1144_v31, 0.0  ;;  %v1155_v19 = vsel %vm1113_vm15, %v1145_v24, 0.0 }
 0x50a   :  { %v1150_v45 = vadd.f32 %v1149_v16, %v1148_v30 }
 0x50c   :  { %v1152_v57 = vadd.f32 %v1151_v33, %v1150_v45 }
 0x50e   :  { %v1154_v63 = vadd.f32 %v1153_v15, %v1152_v57 }
 0x510   :  { %v1156_v44 = vadd.f32 %v1155_v19, %v1154_v63 }
 0x512   :  { %1157 = vadd.xlane.f32.xlu1 %v1156_v44 }
 0x59f   :  { %v1158_v0 = vpop.xlane.xlu1 %1157 }
 0x5a0   :  { %v1159_v5 = vmul.f32 0.001953125, %v1158_v0 }
 0x5a2   :  { %v1160_v58 = vadd.f32 1e-05, %v1159_v5 }
 0x5a4   :  { %1669 = vrsqrt.f32 %v1160_v58 }
 0x5ae   :  { %v1670_v4 = vpop.eup %1669 }
 0x5af   :  { %v1163_v27 = vmul.f32 %v1670_v4, %v1135_v61  ;;  %v1162_v55 = vmul.f32 %v1670_v4, %v1134_v59  ;;  %v1165_v23 = vmul.f32 %v1670_v4, %v1137_v29  ;;  %v1164_v28 = vmul.f32 %v1670_v4, %v1136_v17 }
 0x5b0   :  { %v1167_v39 = vmul.f32 %v1670_v4, %v1139_v9  ;;  %v1166_v12 = vmul.f32 %v1670_v4, %v1138_v51 }
 0x5b1   :  { %v1169_v36 = vmul.f32 %v1163_v27, %v2159_v40  ;;  %v1168_v41 = vmul.f32 %v1162_v55, %v2159_v40  ;;  %v1171_v46 = vmul.f32 %v1165_v23, %v2159_v40  ;;  %v1170_v60 = vmul.f32 %v1164_v28, %v2159_v40 }
 0x5b2   :  { %v1173_v32 = vmul.f32 %v1167_v39, %v2159_v40  ;;  %v1172_v34 = vmul.f32 %v1166_v12, %v2159_v40 }
 0x5b3   :  { %v1175_v42 = vadd.f32 %v1169_v36, %v2161_v53  ;;  %v1174_v8 = vadd.f32 %v1168_v41, %v2161_v53  ;;  %v1177_v11 = vadd.f32 %v1171_v46, %v2161_v53  ;;  %v1176_v35 = vadd.f32 %v1170_v60, %v2161_v53 }
 0x5b4   :  { %v1179_v7 = vadd.f32 %v1173_v32, %v2161_v53  ;;  %v1178_v54 = vadd.f32 %v1172_v34, %v2161_v53 }
 0x5b5   :  { %vm1181_vm0 = vcmp.ge.f32.partialorder %v1175_v42, 0.0  ;;  %v1187_v37 = vmul.f32 0.01, %v1175_v42  ;;  %vm1180_vm1 = vcmp.ge.f32.partialorder %v1174_v8, 0.0  ;;  %v1186_v20 = vmul.f32 0.01, %v1174_v8 }
 0x5b6   :  { %vm1183_vm2 = vcmp.ge.f32.partialorder %v1177_v11, 0.0  ;;  %v1189_v21 = vmul.f32 0.01, %v1177_v11  ;;  %vm1182_vm3 = vcmp.ge.f32.partialorder %v1176_v35, 0.0  ;;  %v1188_v40 = vmul.f32 0.01, %v1176_v35 }
 0x5b7   :  { %v1193_v13 = vsel %vm1181_vm0, %v1175_v42, %v1187_v37  ;;  %v1192_v43 = vsel %vm1180_vm1, %v1174_v8, %v1186_v20  ;;  %vm1185_vm6 = vcmp.ge.f32.partialorder %v1179_v7, 0.0  ;;  %v1191_v52 = vmul.f32 0.01, %v1179_v7 }
 0x5b8   :  { %v2506_v10 = vmul.f32 %v1193_v13, %v2134_v2  ;;  %v2509_v1 = vmul.f32 %v1192_v43, %v2132_v56  ;;  %v1195_v48 = vsel %vm1183_vm2, %v1177_v11, %v1189_v21  ;;  %v1194_v53 = vsel %vm1182_vm3, %v1176_v35, %v1188_v40 }
 0x5b9   :  { %v2512_v6 = vmul.f32 %v1195_v48, %v2140_v26  ;;  %v2515_v59 = vmul.f32 %v1194_v53, %v2138_v25  ;;  %v1197_v61 = vsel %vm1185_vm6, %v1179_v7, %v1191_v52  ;;  %vm1184_vm8 = vcmp.ge.f32.partialorder %v1178_v54, 0.0 }
 0x5ba   :  { %1221 = vrot.lane.b32.xlu1 %v2506_v10, %s1675_s13  ;;  %1219 = vrot.lane.b32.xlu0 %v2509_v1, %s1675_s13  ;;  %v1210_v56 = vcombine.low %v2509_v1, %v2506_v10  ;;  %v1190_v2 = vmul.f32 0.01, %v1178_v54  ;;  %v2526_v26 = vmul.f32 %v1197_v61, %v2146_v38 }
 0x5bb   :  { %v1211_v17 = vcombine.low %v2515_v59, %v2512_v6 }
 0x5bc   :  { %1216 = vst [vmem:[%s2631_s6] sm:$0xff] %v1210_v56  ;;  %v1196_v25 = vsel %vm1184_vm8, %v1178_v54, %v1190_v2 }
 0x5bd   :  { %1217 = vst [vmem:[%s2631_s6 + $0x8] sm:$0xff] %v1211_v17  ;;  %v2535_v29 = vmul.f32 %v1196_v25, %v2142_v18 }
 0x5be   :  { %1225 = vrot.lane.b32.xlu1 %v2512_v6, %s1675_s13  ;;  %1223 = vrot.lane.b32.xlu0 %v2515_v59, %s1675_s13 }
 0x5bf   :  { %v1212_v38 = vcombine.low %v2535_v29, %v2526_v26 }
 0x5c1   :  { %1218 = vst [vmem:[%s2631_s6 + $0x10] sm:$0xff] %v1212_v38 }
 0x5c2   :  { %1229 = vrot.lane.b32.xlu1 %v2526_v26, %s1675_s13  ;;  %1227 = vrot.lane.b32.xlu0 %v2535_v29, %s1675_s13 }
 0x5c6   :  { %1245 = vrot.lane.b32.xlu1 %v2506_v10, %s1676_s14  ;;  %1243 = vrot.lane.b32.xlu0 %v2509_v1, %s1676_s14 }
 0x5ca   :  { %1249 = vrot.lane.b32.xlu1 %v2512_v6, %s1676_s14  ;;  %1247 = vrot.lane.b32.xlu0 %v2515_v59, %s1676_s14 }
 0x5ce   :  { %1253 = vrot.lane.b32.xlu1 %v2526_v26, %s1676_s14  ;;  %1251 = vrot.lane.b32.xlu0 %v2535_v29, %s1676_s14 }
 0x5d2   :  { %1263 = vrot.lane.b32.xlu1 %v2506_v10, %s1679_s0  ;;  %1261 = vrot.lane.b32.xlu0 %v2509_v1, %s1679_s0 }
 0x5d6   :  { %1267 = vrot.lane.b32.xlu1 %v2512_v6, %s1679_s0  ;;  %1265 = vrot.lane.b32.xlu0 %v2515_v59, %s1679_s0 }
 0x5da   :  { %1271 = vrot.lane.b32.xlu1 %v2526_v26, %s1679_s0  ;;  %1269 = vrot.lane.b32.xlu0 %v2535_v29, %s1679_s0 }
 0x62c   :  { %v1222_v18 = vpop.permute.xlu1 %1221  ;;  %v1220_v51 = vpop.permute.xlu0 %1219 }
 0x62d   :  { %v1235_v57 = vsel %vm123_vm4, %v1220_v51, %v1222_v18 }
 0x62e   :  { %v1237_v55 = vmax.f32 %v2509_v1, %v1235_v57 }
 0x630   :  { %v1226_v50 = vpop.permute.xlu1 %1225  ;;  %v1224_v3 = vpop.permute.xlu0 %1223 }
 0x631   :  { %v1233_v15 = vsel %vm123_vm4, %v1224_v3, %v1226_v50  ;;  %v1234_v63 = vsel %vm123_vm4, %v1222_v18, %v1224_v3 }
 0x632   :  { %v1238_v12 = vmax.f32 %v2506_v10, %v1234_v63  ;;  %v1239_v36 = vmax.f32 %v2515_v59, %v1233_v15 }
 0x634   :  { %v1230_v62 = vpop.permute.xlu1 %1229  ;;  %v1228_v9 = vpop.permute.xlu0 %1227 }
 0x635   :  { %v1236_v19 = vsel %vm123_vm4, %v1230_v62, %v1220_v51  ;;  %v1231_v0 = vsel %vm123_vm4, %v1228_v9, %v1230_v62  ;;  %v1232_v5 = vsel %vm123_vm4, %v1226_v50, %v1228_v9 }
 0x636   :  { %v1242_v41 = vmax.f32 %v2526_v26, %v1236_v19  ;;  %v1240_v60 = vmax.f32 %v2512_v6, %v1232_v5  ;;  %v1241_v32 = vmax.f32 %v2535_v29, %v1231_v0 }
 0x638   :  { %v1246_v47 = vpop.permute.xlu1 %1245  ;;  %v1244_v49 = vpop.permute.xlu0 %1243 }
 0x639   :  { %v1259_v44 = vsel %vm161_vm5, %v1244_v49, %v1246_v47 }
 0x63c   :  { %v1250_v22 = vpop.permute.xlu1 %1249  ;;  %v1248_v30 = vpop.permute.xlu0 %1247 }
 0x63d   :  { %v1258_v23 = vsel %vm161_vm5, %v1246_v47, %v1248_v30  ;;  %v1257_v34 = vsel %vm161_vm5, %v1248_v30, %v1250_v22 }
 0x640   :  { %v1254_v31 = vpop.permute.xlu1 %1253  ;;  %v1252_v16 = vpop.permute.xlu0 %1251 }
 0x641   :  { %v1260_v42 = vsel %vm161_vm5, %v1254_v31, %v1244_v49  ;;  %v1255_v8 = vsel %vm161_vm5, %v1252_v16, %v1254_v31  ;;  %v1256_v20 = vsel %vm161_vm5, %v1250_v22, %v1252_v16 }
 0x644   :  { %v1264_v45 = vpop.permute.xlu1 %1263  ;;  %v1262_v24 = vpop.permute.xlu0 %1261 }
 0x645   :  { %v1277_v33 = vsel %vm180_vm7, %v1262_v24, %v1264_v45 }
 0x646   :  { %v1279_v58 = vmax.f32 %v1259_v44, %v1277_v33 }
 0x648   :  { %v1268_v4 = vpop.permute.xlu1 %1267  ;;  %v1266_v27 = vpop.permute.xlu0 %1265  ;;  %v1285_v11 = vmax.f32 %v1237_v55, %v1279_v58 }
 0x649   :  { %v1275_v28 = vsel %vm180_vm7, %v1266_v27, %v1268_v4  ;;  %v1276_v39 = vsel %vm180_vm7, %v1264_v45, %v1266_v27 }
 0x64a   :  { %v1280_v46 = vmax.f32 %v1258_v23, %v1276_v39  ;;  %v1281_v35 = vmax.f32 %v1257_v34, %v1275_v28 }
 0x64c   :  { %v1286_v7 = vmax.f32 %v1238_v12, %v1280_v46  ;;  %v1272_v54 = vpop.permute.xlu1 %1271  ;;  %v1270_v37 = vpop.permute.xlu0 %1269  ;;  %v1287_v48 = vmax.f32 %v1239_v36, %v1281_v35 }
 0x64d   :  { %v1278_v21 = vsel %vm180_vm7, %v1272_v54, %v1262_v24  ;;  %v1273_v40 = vsel %vm180_vm7, %v1270_v37, %v1272_v54  ;;  %v1274_v13 = vsel %vm180_vm7, %v1268_v4, %v1270_v37 }
 0x64e   :  { %v1297_v43 = vcombine.low %v1285_v11, %v1286_v7  ;;  %v1284_v52 = vmax.f32 %v1260_v42, %v1278_v21  ;;  %v1282_v10 = vmax.f32 %v1256_v20, %v1274_v13  ;;  %v1283_v1 = vmax.f32 %v1255_v8, %v1273_v40 }
 0x650   :  { %1303 = vst [vmem:[%s2632_s7] sm:$0xff] %v1297_v43  ;;  %v1290_v53 = vmax.f32 %v1242_v41, %v1284_v52  ;;  %v1288_v6 = vmax.f32 %v1240_v60, %v1282_v10  ;;  %v1289_v59 = vmax.f32 %v1241_v32, %v1283_v1 }
 0x652   :  { %v1298_v61 = vcombine.low %v1287_v48, %v1288_v6  ;;  %v1299_v56 = vcombine.low %v1289_v59, %v1290_v53 }
 0x654   :  { %1304 = vst [vmem:[%s2632_s7 + $0x8] sm:$0xff] %v1298_v61  ;;  %1305 = vst [vmem:[%s2632_s7 + $0x10] sm:$0xff] %v1299_v56 }

</bundles_post_ra>
